<compile_context>
chip_gen: v7x
topology: tpu7x:2x2x1
jax: 0.10.0
libtpu: 0.0.40
codegen_flags: <defaults>
</compile_context>

<pallas_src>
import functools

import jax
import jax.numpy as jnp
from jax.experimental import pallas as pl
from jax.experimental.pallas import tpu as pltpu


def _scores_kernel(feat_ref, wt_ref, b_ref, a_ref, scores_ref, mx_ref, sm_ref, *, inv_s):
    s = pl.program_id(1)

    @pl.when(s == 0)
    def _init():
        mx_ref[...] = jnp.full_like(mx_ref, -jnp.inf)
        sm_ref[...] = jnp.zeros_like(sm_ref)

    f = feat_ref[...].astype(jnp.float32)                               # (ts, C)
    mx_ref[...] = jnp.maximum(mx_ref[...], jnp.max(f, axis=0, keepdims=True))
    sm_ref[...] = sm_ref[...] + jnp.sum(f, axis=0, keepdims=True)

    @pl.when(s == pl.num_programs(1) - 1)
    def _finalize():
        # Row 0 = max-pooled, row 1 = avg-pooled; both branches share conv1,
        # so one (2,C)@(C,C) matmul per layer serves both.
        x = jnp.concatenate([mx_ref[...], sm_ref[...] * inv_s], axis=0)  # (2, C)
        conv_num = wt_ref.shape[0]                                       # static -> unrolled
        for k in range(conv_num):
            w = wt_ref[k]                                                # (C, C), pre-transposed: y = x @ w
            bk = b_ref[k:k + 1, :]                                       # (1, C)
            ak = a_ref[k:k + 1, :]                                       # (1, C) PReLU slope
            y = jnp.dot(x, w, preferred_element_type=jnp.float32) + bk
            x = jnp.where(y >= 0, y, y * ak) + x                         # PReLU + residual
        z = x[0:1, :] + x[1:2, :]
        scores_ref[...] = (1.0 / (1.0 + jnp.exp(-z))).astype(scores_ref.dtype)


def _scale_kernel(feat_ref, scores_ref, out_ref):
    # (ts, C) * (1, C) broadcast -> (ts, C), lane-dense store.
    out_ref[...] = (feat_ref[...] * scores_ref[...]).astype(out_ref.dtype)


def _spatial_tile(s, c, cap_bytes=1 << 20, cap_rows=2048):
    """Largest spatial tile that divides s, is a multiple of 8, and keeps one
    (ts, C) f32 buffer under ~cap_bytes (bigger tiles -> closer to HBM roofline)."""
    cap = min(cap_rows, max(8, (cap_bytes // max(1, 4 * c)) // 8 * 8))
    if s <= cap:
        return s
    for ts in range(cap - cap % 8, 7, -8):
        if s % ts == 0:
            return ts
    return s  # no divisor found; full-extent block is always legal


def channel_features_forward(features, conv_w, conv_b, prelu_a, *, spatial_cap_bytes=1 << 20):
    """features: (B,H,W,C); conv_w: (K,C,C) [out,in]; conv_b: (K,C); prelu_a: (K,)."""
    B, H, W, C = features.shape
    K = conv_w.shape[0]
    S = H * W
    feats2d = features.reshape(B, S, C)
    wt = jnp.transpose(conv_w, (0, 2, 1)).astype(jnp.float32)            # y = x @ wt[k]
    alphas = jnp.broadcast_to(prelu_a.reshape(K, 1), (K, C)).astype(jnp.float32)

    ts = _spatial_tile(S, C, cap_bytes=spatial_cap_bytes)
    n_s = S // ts
    vmem_limit = 32 * 1024 * 1024  # within scoped limit on v5e/v6e/v7x; tiles stay far below

    scores = pl.pallas_call(
        functools.partial(_scores_kernel, inv_s=1.0 / S),
        out_shape=jax.ShapeDtypeStruct((B, 1, C), jnp.float32),
        grid_spec=pltpu.PrefetchScalarGridSpec(
            num_scalar_prefetch=0,
            grid=(B, n_s),
            in_specs=[
                pl.BlockSpec((pl.Squeezed(), ts, C), lambda b, s: (b, s, 0)),
                pl.BlockSpec((K, C, C), lambda b, s: (0, 0, 0)),  # weights stay resident
                pl.BlockSpec((K, C), lambda b, s: (0, 0)),
                pl.BlockSpec((K, C), lambda b, s: (0, 0)),
            ],
            out_specs=pl.BlockSpec((pl.Squeezed(), 1, C), lambda b, s: (b, 0, 0)),
            scratch_shapes=[
                pltpu.VMEM((1, C), jnp.float32),   # running max
                pltpu.VMEM((1, C), jnp.float32),   # running sum
            ],
        ),
        compiler_params=pltpu.CompilerParams(
            dimension_semantics=("parallel", "arbitrary"),
            vmem_limit_bytes=vmem_limit,
        ),
        cost_estimate=pl.CostEstimate(
            flops=int(2 * B * S * C + B * K * (2 * 2 * C * C + 8 * C) + 4 * B * C),
            transcendentals=int(B * C),
            bytes_accessed=int(4 * (B * S * C + K * C * C + 2 * K * C + B * C)),
        ),
    )(feats2d, wt, conv_b.astype(jnp.float32), alphas)

    out2d = pl.pallas_call(
        _scale_kernel,
        out_shape=jax.ShapeDtypeStruct((B, S, C), features.dtype),
        grid_spec=pltpu.PrefetchScalarGridSpec(
            num_scalar_prefetch=0,
            grid=(B, n_s),
            in_specs=[
                pl.BlockSpec((pl.Squeezed(), ts, C), lambda b, s: (b, s, 0)),
                pl.BlockSpec((pl.Squeezed(), 1, C), lambda b, s: (b, 0, 0)),
            ],
            out_specs=pl.BlockSpec((pl.Squeezed(), ts, C), lambda b, s: (b, s, 0)),
        ),
        compiler_params=pltpu.CompilerParams(
            dimension_semantics=("parallel", "parallel"),
            vmem_limit_bytes=vmem_limit,
        ),
        cost_estimate=pl.CostEstimate(
            flops=int(B * S * C),
            transcendentals=0,
            bytes_accessed=int(4 * (2 * B * S * C + B * C)),
        ),
    )(feats2d, scores)

    return out2d.reshape(B, H, W, C)


def _reference(features, conv_w, conv_b, prelu_a):
    """Plain-JAX reference of the PyTorch forward."""
    x_max = jnp.max(features, axis=(1, 2))      # (B, C)
    x_avg = jnp.mean(features, axis=(1, 2))     # (B, C)
    x1, x2 = x_max, x_avg
    for k in range(conv_w.shape[0]):
        def block(x):
            y = x @ conv_w[k].T + conv_b[k]
            y = jnp.where(y >= 0, y, prelu_a[k] * y)
            return y + x
        x1 = block(x1)
        x2 = block(x2)
    scores = jax.nn.sigmoid(x1 + x2)
    return features * scores[:, None, None, :]


if __name__ == "__main__":
    # Small shapes consistent with the module (channel-last features, embedding_dims=C).
    # C=128 keeps the channel (lane) dim full-width; conv_num=7 matches the default.
    B, H, W, C = 2, 32, 32, 128
    K = 7

    key = jax.random.PRNGKey(0)
    k_feat, k_w, k_b = jax.random.split(key, 3)
    features = jax.random.normal(k_feat, (B, H, W, C), dtype=jnp.float32)

    # Deterministic params. Note: self.conv2 is defined in the PyTorch __init__ but
    # never used in forward (conv1 is applied to both branches), so it is omitted.
    bound = 1.0 / jnp.sqrt(C)
    conv_w = jax.random.uniform(k_w, (K, C, C), minval=-bound, maxval=bound, dtype=jnp.float32)
    conv_b = jax.random.uniform(k_b, (K, C), minval=-bound, maxval=bound, dtype=jnp.float32)
    prelu_a = jnp.full((K,), 0.25, dtype=jnp.float32)   # nn.PReLU() default init

    ref = _reference(features, conv_w, conv_b, prelu_a)

    # 1) Default tiling (single spatial tile for this S).
    out = channel_features_forward(features, conv_w, conv_b, prelu_a)
    out = jax.block_until_ready(out)
    assert out.shape == (B, H, W, C)
    assert jnp.allclose(out, ref, atol=1e-5, rtol=1e-5)

    # 2) Forced small spatial tiles to exercise the multi-tile reduction path.
    out_tiled = channel_features_forward(features, conv_w, conv_b, prelu_a,
                                         spatial_cap_bytes=128 * C * 4)
    out_tiled = jax.block_until_ready(out_tiled)
    assert jnp.allclose(out_tiled, ref, atol=1e-5, rtol=1e-5)

    print("KERNEL_OK")
</pallas_src>

<mosaic_0001>
module attributes {stable_mosaic.version = 11 : i64} {
  func.func @_scores_kernel(%arg0: i32, %arg1: i32, %arg2: memref<1x1024x128xf32, #tpu.memory_space<vmem>>, %arg3: memref<7x128x128xf32, #tpu.memory_space<vmem>>, %arg4: memref<7x128xf32, #tpu.memory_space<vmem>>, %arg5: memref<7x128xf32, #tpu.memory_space<vmem>>, %arg6: memref<1x1x128xf32, #tpu.memory_space<vmem>>, %arg7: memref<1x128xf32, #tpu.memory_space<vmem>>, %arg8: memref<1x128xf32, #tpu.memory_space<vmem>>) attributes {dimension_semantics = [#tpu.dimension_semantics<parallel>, #tpu.dimension_semantics<arbitrary>], iteration_bounds = array<i64: 2, 1>, scalar_prefetch = 0 : i64, scratch_operands = 2 : i64, tpu.core_type = #tpu.core_type<tc>, window_params = [{transform_indices = @transform_0, window_bounds = array<i64: 1, 1024, 128>}, {pipeline_mode = #tpu.pipeline_mode<synchronous>, transform_indices = @transform_1, window_bounds = array<i64: 7, 128, 128>}, {pipeline_mode = #tpu.pipeline_mode<synchronous>, transform_indices = @transform_2, window_bounds = array<i64: 7, 128>}, {pipeline_mode = #tpu.pipeline_mode<synchronous>, transform_indices = @transform_3, window_bounds = array<i64: 7, 128>}, {transform_indices = @transform_4, window_bounds = array<i64: 1, 1, 128>}]} {
    %c0_i32 = arith.constant 0 : i32
    %0 = arith.cmpi eq, %arg1, %c0_i32 : i32
    %1 = arith.extui %0 : i1 to i32
    %c0_i32_0 = arith.constant 0 : i32
    %2 = arith.cmpi ne, %1, %c0_i32_0 : i32
    scf.if %2 {
      %cst_14 = arith.constant 0xFF800000 : f32
      %18 = vector.broadcast %cst_14 : f32 to vector<1x128xf32>
      %c0_15 = arith.constant 0 : index
      %c0_16 = arith.constant 0 : index
      %19 = vector.load %arg7[%c0_15, %c0_16] : memref<1x128xf32, #tpu.memory_space<vmem>>, vector<1x128xf32>
      tpu.vector_store %arg7[%c0_15, %c0_16], %18 {strides = array<i32>} : memref<1x128xf32, #tpu.memory_space<vmem>>, vector<1x128xf32>,
      %cst_17 = arith.constant 0.000000e+00 : f32
      %20 = vector.broadcast %cst_17 : f32 to vector<1x128xf32>
      %c0_18 = arith.constant 0 : index
      %c0_19 = arith.constant 0 : index
      %21 = vector.load %arg8[%c0_18, %c0_19] : memref<1x128xf32, #tpu.memory_space<vmem>>, vector<1x128xf32>
      tpu.vector_store %arg8[%c0_18, %c0_19], %20 {strides = array<i32>} : memref<1x128xf32, #tpu.memory_space<vmem>>, vector<1x128xf32>,
    } else {
    }
    %c0 = arith.constant 0 : index
    %c0_1 = arith.constant 0 : index
    %c0_2 = arith.constant 0 : index
    %3 = vector.load %arg2[%c0, %c0_1, %c0_2] : memref<1x1024x128xf32, #tpu.memory_space<vmem>>, vector<1x1024x128xf32>
    %4 = vector.shape_cast %3 : vector<1x1024x128xf32> to vector<1024x128xf32>
    %c0_3 = arith.constant 0 : index
    %c0_4 = arith.constant 0 : index
    %5 = vector.load %arg7[%c0_3, %c0_4] : memref<1x128xf32, #tpu.memory_space<vmem>>, vector<1x128xf32>
    %cst = arith.constant dense<0xFF800000> : vector<128xf32>
    %6 = vector.multi_reduction <maximumf>, %4, %cst [0] : vector<1024x128xf32> to vector<128xf32>
    %7 = vector.shape_cast %6 : vector<128xf32> to vector<1x128xf32>
    %8 = arith.maximumf %5, %7 : vector<1x128xf32>
    %c0_5 = arith.constant 0 : index
    %c0_6 = arith.constant 0 : index
    %9 = vector.load %arg7[%c0_5, %c0_6] : memref<1x128xf32, #tpu.memory_space<vmem>>, vector<1x128xf32>
    tpu.vector_store %arg7[%c0_5, %c0_6], %8 {strides = array<i32>} : memref<1x128xf32, #tpu.memory_space<vmem>>, vector<1x128xf32>,
    %c0_7 = arith.constant 0 : index
    %c0_8 = arith.constant 0 : index
    %10 = vector.load %arg8[%c0_7, %c0_8] : memref<1x128xf32, #tpu.memory_space<vmem>>, vector<1x128xf32>
    %cst_9 = arith.constant dense<0.000000e+00> : vector<128xf32>
    %11 = vector.multi_reduction <add>, %4, %cst_9 [0] : vector<1024x128xf32> to vector<128xf32>
    %12 = vector.shape_cast %11 : vector<128xf32> to vector<1x128xf32>
    %13 = arith.addf %10, %12 : vector<1x128xf32>
    %c0_10 = arith.constant 0 : index
    %c0_11 = arith.constant 0 : index
    %14 = vector.load %arg8[%c0_10, %c0_11] : memref<1x128xf32, #tpu.memory_space<vmem>>, vector<1x128xf32>
    tpu.vector_store %arg8[%c0_10, %c0_11], %13 {strides = array<i32>} : memref<1x128xf32, #tpu.memory_space<vmem>>, vector<1x128xf32>,
    %c0_i32_12 = arith.constant 0 : i32
    %15 = arith.cmpi eq, %arg1, %c0_i32_12 : i32
    %16 = arith.extui %15 : i1 to i32
    %c0_i32_13 = arith.constant 0 : i32
    %17 = arith.cmpi ne, %16, %c0_i32_13 : i32
    scf.if %17 {
      %c0_14 = arith.constant 0 : index
      %c0_15 = arith.constant 0 : index
      %18 = vector.load %arg7[%c0_14, %c0_15] : memref<1x128xf32, #tpu.memory_space<vmem>>, vector<1x128xf32>
      %c0_16 = arith.constant 0 : index
      %c0_17 = arith.constant 0 : index
      %19 = vector.load %arg8[%c0_16, %c0_17] : memref<1x128xf32, #tpu.memory_space<vmem>>, vector<1x128xf32>
      %cst_18 = arith.constant 9.765625E-4 : f32
      %20 = vector.broadcast %cst_18 : f32 to vector<1x128xf32>
      %21 = arith.mulf %19, %20 : vector<1x128xf32>
      %22 = tpu.concatenate %18, %21 in 0 : vector<1x128xf32>, vector<1x128xf32> -> vector<2x128xf32>
      %c0_19 = arith.constant 0 : index
      %c0_20 = arith.constant 0 : index
      %c0_21 = arith.constant 0 : index
      %23 = vector.load %arg3[%c0_19, %c0_20, %c0_21] : memref<7x128x128xf32, #tpu.memory_space<vmem>>, vector<1x128x128xf32>
      %24 = vector.shape_cast %23 : vector<1x128x128xf32> to vector<128x128xf32>
      %c0_22 = arith.constant 0 : index
      %c0_23 = arith.constant 0 : index
      %25 = vector.load %arg4[%c0_22, %c0_23] : memref<7x128xf32, #tpu.memory_space<vmem>>, vector<1x128xf32>
      %c0_24 = arith.constant 0 : index
      %c0_25 = arith.constant 0 : index
      %26 = vector.load %arg5[%c0_24, %c0_25] : memref<7x128xf32, #tpu.memory_space<vmem>>, vector<1x128xf32>
      %cst_26 = arith.constant dense<0.000000e+00> : vector<2x128xf32>
      %27 = tpu.matmul %22, %24, %cst_26 {dimension_numbers = #tpu.dot_dimension_numbers<[1], [0], [0], [1], [0, 0, 1, 1], [], []>} : vector<2x128xf32>, vector<128x128xf32>, vector<2x128xf32> -> vector<2x128xf32>
      %28 = vector.broadcast %25 : vector<1x128xf32> to vector<2x128xf32>
      %29 = arith.addf %27, %28 : vector<2x128xf32>
      %cst_27 = arith.constant 0.000000e+00 : f32
      %30 = vector.broadcast %cst_27 : f32 to vector<2x128xf32>
      %31 = arith.cmpf oge, %29, %30 : vector<2x128xf32>
      %32 = vector.broadcast %26 : vector<1x128xf32> to vector<2x128xf32>
      %33 = arith.mulf %29, %32 : vector<2x128xf32>
      %34 = arith.select %31, %29, %33 : vector<2x128xi1>, vector<2x128xf32>
      %35 = arith.addf %34, %22 : vector<2x128xf32>
      %c1 = arith.constant 1 : index
      %c0_28 = arith.constant 0 : index
      %c0_29 = arith.constant 0 : index
      %36 = vector.load %arg3[%c1, %c0_28, %c0_29] : memref<7x128x128xf32, #tpu.memory_space<vmem>>, vector<1x128x128xf32>
      %37 = vector.shape_cast %36 : vector<1x128x128xf32> to vector<128x128xf32>
      %c1_30 = arith.constant 1 : index
      %c0_31 = arith.constant 0 : index
      %38 = vector.load %arg4[%c1_30, %c0_31] : memref<7x128xf32, #tpu.memory_space<vmem>>, vector<1x128xf32>
      %c1_32 = arith.constant 1 : index
      %c0_33 = arith.constant 0 : index
      %39 = vector.load %arg5[%c1_32, %c0_33] : memref<7x128xf32, #tpu.memory_space<vmem>>, vector<1x128xf32>
      %cst_34 = arith.constant dense<0.000000e+00> : vector<2x128xf32>
      %40 = tpu.matmul %35, %37, %cst_34 {dimension_numbers = #tpu.dot_dimension_numbers<[1], [0], [0], [1], [0, 0, 1, 1], [], []>} : vector<2x128xf32>, vector<128x128xf32>, vector<2x128xf32> -> vector<2x128xf32>
      %41 = vector.broadcast %38 : vector<1x128xf32> to vector<2x128xf32>
      %42 = arith.addf %40, %41 : vector<2x128xf32>
      %cst_35 = arith.constant 0.000000e+00 : f32
      %43 = vector.broadcast %cst_35 : f32 to vector<2x128xf32>
      %44 = arith.cmpf oge, %42, %43 : vector<2x128xf32>
      %45 = vector.broadcast %39 : vector<1x128xf32> to vector<2x128xf32>
      %46 = arith.mulf %42, %45 : vector<2x128xf32>
      %47 = arith.select %44, %42, %46 : vector<2x128xi1>, vector<2x128xf32>
      %48 = arith.addf %47, %35 : vector<2x128xf32>
      %c2 = arith.constant 2 : index
      %c0_36 = arith.constant 0 : index
      %c0_37 = arith.constant 0 : index
      %49 = vector.load %arg3[%c2, %c0_36, %c0_37] : memref<7x128x128xf32, #tpu.memory_space<vmem>>, vector<1x128x128xf32>
      %50 = vector.shape_cast %49 : vector<1x128x128xf32> to vector<128x128xf32>
      %c2_38 = arith.constant 2 : index
      %c0_39 = arith.constant 0 : index
      %51 = vector.load %arg4[%c2_38, %c0_39] : memref<7x128xf32, #tpu.memory_space<vmem>>, vector<1x128xf32>
      %c2_40 = arith.constant 2 : index
      %c0_41 = arith.constant 0 : index
      %52 = vector.load %arg5[%c2_40, %c0_41] : memref<7x128xf32, #tpu.memory_space<vmem>>, vector<1x128xf32>
      %cst_42 = arith.constant dense<0.000000e+00> : vector<2x128xf32>
      %53 = tpu.matmul %48, %50, %cst_42 {dimension_numbers = #tpu.dot_dimension_numbers<[1], [0], [0], [1], [0, 0, 1, 1], [], []>} : vector<2x128xf32>, vector<128x128xf32>, vector<2x128xf32> -> vector<2x128xf32>
      %54 = vector.broadcast %51 : vector<1x128xf32> to vector<2x128xf32>
      %55 = arith.addf %53, %54 : vector<2x128xf32>
      %cst_43 = arith.constant 0.000000e+00 : f32
      %56 = vector.broadcast %cst_43 : f32 to vector<2x128xf32>
      %57 = arith.cmpf oge, %55, %56 : vector<2x128xf32>
      %58 = vector.broadcast %52 : vector<1x128xf32> to vector<2x128xf32>
      %59 = arith.mulf %55, %58 : vector<2x128xf32>
      %60 = arith.select %57, %55, %59 : vector<2x128xi1>, vector<2x128xf32>
      %61 = arith.addf %60, %48 : vector<2x128xf32>
      %c3 = arith.constant 3 : index
      %c0_44 = arith.constant 0 : index
      %c0_45 = arith.constant 0 : index
      %62 = vector.load %arg3[%c3, %c0_44, %c0_45] : memref<7x128x128xf32, #tpu.memory_space<vmem>>, vector<1x128x128xf32>
      %63 = vector.shape_cast %62 : vector<1x128x128xf32> to vector<128x128xf32>
      %c3_46 = arith.constant 3 : index
      %c0_47 = arith.constant 0 : index
      %64 = vector.load %arg4[%c3_46, %c0_47] : memref<7x128xf32, #tpu.memory_space<vmem>>, vector<1x128xf32>
      %c3_48 = arith.constant 3 : index
      %c0_49 = arith.constant 0 : index
      %65 = vector.load %arg5[%c3_48, %c0_49] : memref<7x128xf32, #tpu.memory_space<vmem>>, vector<1x128xf32>
      %cst_50 = arith.constant dense<0.000000e+00> : vector<2x128xf32>
      %66 = tpu.matmul %61, %63, %cst_50 {dimension_numbers = #tpu.dot_dimension_numbers<[1], [0], [0], [1], [0, 0, 1, 1], [], []>} : vector<2x128xf32>, vector<128x128xf32>, vector<2x128xf32> -> vector<2x128xf32>
      %67 = vector.broadcast %64 : vector<1x128xf32> to vector<2x128xf32>
      %68 = arith.addf %66, %67 : vector<2x128xf32>
      %cst_51 = arith.constant 0.000000e+00 : f32
      %69 = vector.broadcast %cst_51 : f32 to vector<2x128xf32>
      %70 = arith.cmpf oge, %68, %69 : vector<2x128xf32>
      %71 = vector.broadcast %65 : vector<1x128xf32> to vector<2x128xf32>
      %72 = arith.mulf %68, %71 : vector<2x128xf32>
      %73 = arith.select %70, %68, %72 : vector<2x128xi1>, vector<2x128xf32>
      %74 = arith.addf %73, %61 : vector<2x128xf32>
      %c4 = arith.constant 4 : index
      %c0_52 = arith.constant 0 : index
      %c0_53 = arith.constant 0 : index
      %75 = vector.load %arg3[%c4, %c0_52, %c0_53] : memref<7x128x128xf32, #tpu.memory_space<vmem>>, vector<1x128x128xf32>
      %76 = vector.shape_cast %75 : vector<1x128x128xf32> to vector<128x128xf32>
      %c4_54 = arith.constant 4 : index
      %c0_55 = arith.constant 0 : index
      %77 = vector.load %arg4[%c4_54, %c0_55] : memref<7x128xf32, #tpu.memory_space<vmem>>, vector<1x128xf32>
      %c4_56 = arith.constant 4 : index
      %c0_57 = arith.constant 0 : index
      %78 = vector.load %arg5[%c4_56, %c0_57] : memref<7x128xf32, #tpu.memory_space<vmem>>, vector<1x128xf32>
      %cst_58 = arith.constant dense<0.000000e+00> : vector<2x128xf32>
      %79 = tpu.matmul %74, %76, %cst_58 {dimension_numbers = #tpu.dot_dimension_numbers<[1], [0], [0], [1], [0, 0, 1, 1], [], []>} : vector<2x128xf32>, vector<128x128xf32>, vector<2x128xf32> -> vector<2x128xf32>
      %80 = vector.broadcast %77 : vector<1x128xf32> to vector<2x128xf32>
      %81 = arith.addf %79, %80 : vector<2x128xf32>
      %cst_59 = arith.constant 0.000000e+00 : f32
      %82 = vector.broadcast %cst_59 : f32 to vector<2x128xf32>
      %83 = arith.cmpf oge, %81, %82 : vector<2x128xf32>
      %84 = vector.broadcast %78 : vector<1x128xf32> to vector<2x128xf32>
      %85 = arith.mulf %81, %84 : vector<2x128xf32>
      %86 = arith.select %83, %81, %85 : vector<2x128xi1>, vector<2x128xf32>
      %87 = arith.addf %86, %74 : vector<2x128xf32>
      %c5 = arith.constant 5 : index
      %c0_60 = arith.constant 0 : index
      %c0_61 = arith.constant 0 : index
      %88 = vector.load %arg3[%c5, %c0_60, %c0_61] : memref<7x128x128xf32, #tpu.memory_space<vmem>>, vector<1x128x128xf32>
      %89 = vector.shape_cast %88 : vector<1x128x128xf32> to vector<128x128xf32>
      %c5_62 = arith.constant 5 : index
      %c0_63 = arith.constant 0 : index
      %90 = vector.load %arg4[%c5_62, %c0_63] : memref<7x128xf32, #tpu.memory_space<vmem>>, vector<1x128xf32>
      %c5_64 = arith.constant 5 : index
      %c0_65 = arith.constant 0 : index
      %91 = vector.load %arg5[%c5_64, %c0_65] : memref<7x128xf32, #tpu.memory_space<vmem>>, vector<1x128xf32>
      %cst_66 = arith.constant dense<0.000000e+00> : vector<2x128xf32>
      %92 = tpu.matmul %87, %89, %cst_66 {dimension_numbers = #tpu.dot_dimension_numbers<[1], [0], [0], [1], [0, 0, 1, 1], [], []>} : vector<2x128xf32>, vector<128x128xf32>, vector<2x128xf32> -> vector<2x128xf32>
      %93 = vector.broadcast %90 : vector<1x128xf32> to vector<2x128xf32>
      %94 = arith.addf %92, %93 : vector<2x128xf32>
      %cst_67 = arith.constant 0.000000e+00 : f32
      %95 = vector.broadcast %cst_67 : f32 to vector<2x128xf32>
      %96 = arith.cmpf oge, %94, %95 : vector<2x128xf32>
      %97 = vector.broadcast %91 : vector<1x128xf32> to vector<2x128xf32>
      %98 = arith.mulf %94, %97 : vector<2x128xf32>
      %99 = arith.select %96, %94, %98 : vector<2x128xi1>, vector<2x128xf32>
      %100 = arith.addf %99, %87 : vector<2x128xf32>
      %c6 = arith.constant 6 : index
      %c0_68 = arith.constant 0 : index
      %c0_69 = arith.constant 0 : index
      %101 = vector.load %arg3[%c6, %c0_68, %c0_69] : memref<7x128x128xf32, #tpu.memory_space<vmem>>, vector<1x128x128xf32>
      %102 = vector.shape_cast %101 : vector<1x128x128xf32> to vector<128x128xf32>
      %c6_70 = arith.constant 6 : index
      %c0_71 = arith.constant 0 : index
      %103 = vector.load %arg4[%c6_70, %c0_71] : memref<7x128xf32, #tpu.memory_space<vmem>>, vector<1x128xf32>
      %c6_72 = arith.constant 6 : index
      %c0_73 = arith.constant 0 : index
      %104 = vector.load %arg5[%c6_72, %c0_73] : memref<7x128xf32, #tpu.memory_space<vmem>>, vector<1x128xf32>
      %cst_74 = arith.constant dense<0.000000e+00> : vector<2x128xf32>
      %105 = tpu.matmul %100, %102, %cst_74 {dimension_numbers = #tpu.dot_dimension_numbers<[1], [0], [0], [1], [0, 0, 1, 1], [], []>} : vector<2x128xf32>, vector<128x128xf32>, vector<2x128xf32> -> vector<2x128xf32>
      %106 = vector.broadcast %103 : vector<1x128xf32> to vector<2x128xf32>
      %107 = arith.addf %105, %106 : vector<2x128xf32>
      %cst_75 = arith.constant 0.000000e+00 : f32
      %108 = vector.broadcast %cst_75 : f32 to vector<2x128xf32>
      %109 = arith.cmpf oge, %107, %108 : vector<2x128xf32>
      %110 = vector.broadcast %104 : vector<1x128xf32> to vector<2x128xf32>
      %111 = arith.mulf %107, %110 : vector<2x128xf32>
      %112 = arith.select %109, %107, %111 : vector<2x128xi1>, vector<2x128xf32>
      %113 = arith.addf %112, %100 : vector<2x128xf32>
      %114 = vector.extract_strided_slice %113 {offsets = [0, 0], sizes = [1, 128], strides = [1, 1]} : vector<2x128xf32> to vector<1x128xf32>
      %115 = vector.extract_strided_slice %113 {offsets = [1, 0], sizes = [1, 128], strides = [1, 1]} : vector<2x128xf32> to vector<1x128xf32>
      %116 = arith.addf %114, %115 : vector<1x128xf32>
      %cst_76 = arith.constant 0.000000e+00 : f32
      %117 = vector.broadcast %cst_76 : f32 to vector<1x128xf32>
      %118 = arith.subf %117, %116 : vector<1x128xf32>
      %119 = math.exp %118 : vector<1x128xf32>
      %cst_77 = arith.constant 1.000000e+00 : f32
      %120 = vector.broadcast %cst_77 : f32 to vector<1x128xf32>
      %121 = arith.addf %120, %119 : vector<1x128xf32>
      %cst_78 = arith.constant 1.000000e+00 : f32
      %122 = vector.broadcast %cst_78 : f32 to vector<1x128xf32>
      %123 = arith.divf %122, %121 : vector<1x128xf32>
      %c0_79 = arith.constant 0 : index
      %c0_80 = arith.constant 0 : index
      %c0_81 = arith.constant 0 : index
      %124 = vector.load %arg6[%c0_79, %c0_80, %c0_81] : memref<1x1x128xf32, #tpu.memory_space<vmem>>, vector<1x1x128xf32>
      %125 = vector.shape_cast %124 : vector<1x1x128xf32> to vector<1x128xf32>
      %126 = vector.shape_cast %123 : vector<1x128xf32> to vector<1x1x128xf32>
      tpu.vector_store %arg6[%c0_79, %c0_80, %c0_81], %126 {strides = array<i32>} : memref<1x1x128xf32, #tpu.memory_space<vmem>>, vector<1x1x128xf32>,
    } else {
    }
    return
  }
  func.func @transform_0(%arg0: i32, %arg1: i32) -> (i32, i32, i32) {
    %c0_i32 = arith.constant 0 : i32
    %c0_i32_0 = arith.constant 0 : i32
    return %arg0, %arg1, %c0_i32 : i32, i32, i32
  }
  func.func @transform_1(%arg0: i32, %arg1: i32) -> (i32, i32, i32) {
    %c0_i32 = arith.constant 0 : i32
    %c0_i32_0 = arith.constant 0 : i32
    %c0_i32_1 = arith.constant 0 : i32
    %c0_i32_2 = arith.constant 0 : i32
    return %c0_i32, %c0_i32_0, %c0_i32_1 : i32, i32, i32
  }
  func.func @transform_2(%arg0: i32, %arg1: i32) -> (i32, i32) {
    %c0_i32 = arith.constant 0 : i32
    %c0_i32_0 = arith.constant 0 : i32
    %c0_i32_1 = arith.constant 0 : i32
    return %c0_i32, %c0_i32_0 : i32, i32
  }
  func.func @transform_3(%arg0: i32, %arg1: i32) -> (i32, i32) {
    %c0_i32 = arith.constant 0 : i32
    %c0_i32_0 = arith.constant 0 : i32
    %c0_i32_1 = arith.constant 0 : i32
    return %c0_i32, %c0_i32_0 : i32, i32
  }
  func.func @transform_4(%arg0: i32, %arg1: i32) -> (i32, i32, i32) {
    %c0_i32 = arith.constant 0 : i32
    %c0_i32_0 = arith.constant 0 : i32
    %c0_i32_1 = arith.constant 0 : i32
    return %arg0, %c0_i32, %c0_i32_0 : i32, i32, i32
  }
}

</mosaic_0001>

<bundles_post_ra>
// kernel: tpu_custom_call.1
= control target key start
LH: loop header
LB: loop body
LE: loop exit
PB: predicated region body
PF: predicated region fallthrough
CT: control target
= control target key end

     0   :  { %9 = vsyncpa [#allocation5], 0  ;;  %s2884_s0 = inlined_call_operand.hbm [shape: f32[2,1024,128], index: 0, kind: input, shape index: {}]   ;;  %s2885_s1 = inlined_call_operand.hbm [shape: f32[7,128,128], index: 1, kind: input, shape index: {}]   ;;  %s2886_s2 = inlined_call_operand.hbm [shape: f32[7,128], index: 2, kind: input, shape index: {}]   ;;  %s2887_s3 = inlined_call_operand.vmem [shape: f32[7,128], index: 3, kind: input, shape index: {}]   ;;  %s2888_s4 = inlined_call_operand.hbm [shape: f32[2,1,128], index: 4, kind: output, shape index: {}]  }
   0x1   :  { %11 = vsyncpa [#allocation5 + $0x1], 0 }
   0x2   :  { %12 = vsyncpa [#allocation8], 0 }
   0x3   :  { %13 = vsyncpa [#allocation6], 0 }
   0x4   :  { %15 = vsyncpa [#allocation6 + $0x1], 0  ;;  %s2370_s15 = smov 0   ;;  %s2372_s16 = smov 0  }
   0x5   :  { %s2374_s17 = smov 0   ;;  %s2376_s18 = smov 0  }
   0x6   :  { %s2378_s19 = smov 0   ;;  %s2380_s20 = smov 0  }
   0x7 LB: > { %s1505_s21 = sadd.s32 4294967295, %s2333_s20   ;;  %s1506_s22 = sadd.s32 4294967294, %s2333_s20   ;;  %s2333_s20 = sphi %s2380_s20, %s21_s20   ;;  %s2329_s19 = sphi %s2378_s19, %s2910_s19   ;;  %s2325_s18 = sphi %s2376_s18, %s2909_s18   ;;  %s2321_s17 = sphi %s2374_s17, %s2908_s17   ;;  %s2317_s16 = sphi %s2372_s16, %s2907_s16   ;;  %s2313_s15 = sphi %s2370_s15, %s2906_s15  }
   0x8   : > { %p55_p0 = scmp.ne.s32.totalorder %s2317_s16, %s2313_s15  ;;  %p2404_p1 = scmp.eq.s32.totalorder %s1505_s21, 0 }
   0x9   : > { %p2408_p2 = scmp.eq.s32.totalorder %s1505_s21, 1  ;;  %p148_p3 = scmp.eq.s32.totalorder %s1506_s22, 1 }
   0xa   : > { %s2893_s23 = scalar_select %p2404_p1, 1, 0 }
   0xb   : > { %p2414_p4 = por %p2404_p1, %p55_p0  ;;  %p1507_p5 = scmp.ge.s32.totalorder %s2333_s20, 1 }
   0xc   : > { %p2419_p6 = por %p148_p3, %p55_p0  ;;  %p155_p7 = scmp.lt.s32.totalorder %s2333_s20, 3 }
   0xd   : > { %s2895_s25 = scalar_select %p2414_p4, 1, 0 }
   0xe   : > { %s2896_s26 = scalar_select %p2419_p6, 1, 0 }
   0xf   : > { %p2424_p8 = pnand %p1507_p5, %p155_p7  ;;  %s2335_s28 = smov [#allocation7]  }
  0x10   : > { %s167_s29 = sshll.u32 %s2335_s28, 4  ;;  %s2336_s5 = smov [#allocation9]   ;;  %s2428_s29 = int_to_ptr.vmem [resolvable:$true] %s167_s29 }
  0x11   : > { %p2080_p9 = pneg %p2424_p8  ;;  %s181_s6 = sshll.u32 %s2336_s5, 4  ;;  %s2439_s6 = int_to_ptr.vmem [resolvable:$true] %s181_s6 }
  0x12   : > { %s2161_s9 = scalar_lea.hbm %s2885_s1, 14336 }
  0x13   : > { %p2435_p11 = pnand %p2080_p9, %p2404_p1  ;;  %p2162_p12 = scmp.ne.s32.totalorder %s2885_s1, %s2161_s9 }
  0x14   : > { %p2168_p5 = scmp.lt.u32.totalorder %s2161_s9, %s2885_s1 }
  0x15   : > { %p2163_p13 = pneg %p2435_p11 }
  0x17   : > { %p2164_p0 = pnand %p2163_p13, %p2162_p12 }
  0x19   : > { %p2165_p3 = pneg %p2164_p0 }
  0x1b   : > { %p2170_p7 = pnand %p2168_p5, %p2165_p3 }
  0x1d   : > { %2173 = shalt.err (!%p2170_p7)
}
  0x1e   : > { %s2174_s14 = scalar_lea.vmem %s2428_s29, 14336  ;;  %p2182_p1 = scmp.lt.s32.totalorder %s2428_s29, %s2428_s29 }
  0x1f   : > { %p2175_p9 = scmp.ne.s32.totalorder %s2428_s29, %s2174_s14  ;;  %p2183_p12 = scmp.lt.s32.totalorder %s2174_s14, %s2174_s14 }
  0x21   : > { %p2177_p10 = pnand %p2175_p9, %p2163_p13  ;;  %p2184_p0 = por %p2183_p12, %p2182_p1 }
  0x23   : > { %p2178_p6 = pneg %p2177_p10 }
  0x25   : > { %p2185_p4 = pnand %p2184_p0, %p2178_p6 }
  0x27   : > { %2188 = shalt.err (!%p2185_p4)
}
  0x28   : > { %s2337_s21 = smov 128   ;;  %s2338_s22 = smov 8  }
  0x29   : > { %2083 = dma.hbm_to_vmem [thread:$0]  (!%p2435_p11), %s2885_s1, 14336, %s2428_s29, [#allocation8], %s2337_s21, %s2337_s21, %s2338_s22  }
  0x2a   : > { %s2189_s9 = scalar_lea.hbm %s2886_s2, 128 }
  0x2b   : > { %p2190_p1 = scmp.ne.s32.totalorder %s2886_s2, %s2189_s9  ;;  %p2196_p10 = scmp.lt.u32.totalorder %s2189_s9, %s2886_s2 }
  0x2d   : > { %p2192_p4 = pnand %p2190_p1, %p2163_p13 }
  0x2f   : > { %p2193_p6 = pneg %p2192_p4 }
  0x31   : > { %p2198_p3 = pnand %p2196_p10, %p2193_p6 }
  0x33   : > { %2201 = shalt.err (!%p2198_p3)
}
  0x34   : > { %s2202_s29 = scalar_lea.vmem %s2439_s6, 128  ;;  %p2210_p12 = scmp.lt.s32.totalorder %s2439_s6, %s2439_s6 }
  0x35   : > { %p2203_p5 = scmp.ne.s32.totalorder %s2439_s6, %s2202_s29  ;;  %p2211_p0 = scmp.lt.s32.totalorder %s2202_s29, %s2202_s29 }
  0x37   : > { %p2205_p7 = pnand %p2203_p5, %p2163_p13  ;;  %p2212_p1 = por %p2211_p0, %p2210_p12 }
  0x39   : > { %p2206_p9 = pneg %p2205_p7 }
  0x3b   : > { %p2213_p4 = pnand %p2212_p1, %p2206_p9 }
  0x3d   : > { %2216 = shalt.err (!%p2213_p4)
}
  0x3e   : > { %2086 = dma.hbm_to_vmem [thread:$0]  (!%p2435_p11), %s2886_s2, 128, %s2439_s6, [#allocation8]  }
  0x3f   : > { %s33_s5 = sadd.s32 1, %s2329_s19  ;;  %s42_s7 = sadd.s32 1, %s2321_s17 }
  0x40   : > { %p35_p13 = scmp.ge.s32.totalorder %s33_s5, 2  ;;  %p49_p6 = scmp.ne.s32.totalorder %s2321_s17, %s2317_s16 }
  0x41   : > { %p50_p10 = scmp.eq.s32.totalorder %s2333_s20, 0  ;;  %p2097_p3 = scmp.lt.s32.totalorder %s2333_s20, 2 }
  0x42   : > { %s2912_s5 = smov (%p35_p13, %s33_s5), 0  ;;  %p2506_p7 = por %p2408_p2, %p49_p6 }
  0x43   : > { %p51_p5 = por %p50_p10, %p49_p6  ;;  %s37_s8 = ssub.s32 %s2329_s19, %s2912_s5 }
  0x44   : > { %s2899_s30 = scalar_select %p2506_p7, 1, 0 }
  0x45   : > { %s195_s9 = sand.u32 1, %s2321_s17   ;;  %p40_p9 = scmp.eq.s32.totalorder %s37_s8, 0 }
  0x46   : > { %s1511_s6 = sshll.u32 %s195_s9, 10  ;;  %s1535_s10 = sshll.u32 %s2329_s19, 14 }
  0x47   : > { %s2515_s11 = scalar_select %p40_p9, %s2321_s17, %s42_s7  }
  0x48   : > { %s2520_s29 = scalar_lea.hbm %s2884_s0, %s1535_s10  ;;  %s199_s24 = scalar_lea.vmem [#allocation4], %s1511_s6 }
  0x49   : > { %s208_s14 = sshll.u32 %s199_s24, 4  ;;  %p2524_p2 = pnand %p2097_p3, %p51_p5  ;;  %s2528_s14 = int_to_ptr.vmem [resolvable:$true] %s208_s14 }
  0x4a   : > { %s2530_s7 = scalar_lea.sflag [#allocation5], %s195_s9  ;;  %s2217_s8 = scalar_lea.hbm %s2520_s29, 16384 }
  0x4b   : > { %p2218_p11 = scmp.ne.s32.totalorder %s2520_s29, %s2217_s8  ;;  %p2219_p12 = pneg %p2524_p2 }
  0x4c   : > { %s2222_s12 = scalar_lea.hbm %s2884_s0, 32768  ;;  %p2223_p4 = scmp.lt.u32.totalorder %s2520_s29, %s2884_s0 }
  0x4d   : > { %p2220_p0 = pnand %p2219_p12, %p2218_p11  ;;  %p2224_p13 = scmp.lt.u32.totalorder %s2222_s12, %s2217_s8 }
  0x4e   : > { %p2226_p10 = scmp.lt.u32.totalorder %s2217_s8, %s2520_s29 }
  0x4f   : > { %p2221_p1 = pneg %p2220_p0  ;;  %p2225_p6 = por %p2224_p13, %p2223_p4 }
  0x51   : > { %p2227_p3 = por %p2226_p10, %p2225_p6 }
  0x53   : > { %p2228_p5 = pnand %p2227_p3, %p2221_p1 }
  0x55   : > { %2231 = shalt.err (!%p2228_p5)
}
  0x56   : > { %s2232_s9 = scalar_lea.vmem %s2528_s14, 16384  ;;  %s2339_s6 = smov [#allocation4]  }
  0x57   : > { %p2233_p9 = scmp.ne.s32.totalorder %s2528_s14, %s2232_s9  ;;  %s2237_s10 = sshll.u32 %s2339_s6, 4  ;;  %s2238_s10 = int_to_ptr.vmem [resolvable:$false] %s2237_s10 }
  0x58   : > { %s2239_s13 = scalar_lea.vmem %s2238_s10, 32768  ;;  %p2240_p7 = scmp.lt.s32.totalorder %s2528_s14, %s2238_s10 }
  0x59   : > { %p2235_p11 = pnand %p2233_p9, %p2219_p12  ;;  %p2241_p4 = scmp.lt.s32.totalorder %s2239_s13, %s2232_s9 }
  0x5b   : > { %p2236_p0 = pneg %p2235_p11  ;;  %p2242_p13 = por %p2241_p4, %p2240_p7 }
  0x5d   : > { %p2243_p6 = pnand %p2242_p13, %p2236_p0 }
  0x5f   : > { %2246 = shalt.err (!%p2243_p6)
}
  0x60   : > { %2090 = dma.hbm_to_vmem [thread:$0]  (!%p2524_p2), %s2520_s29, 16384, %s2528_s14, %s2530_s7, %s2337_s21, %s2337_s21, %s2338_s22  }
  0x61   : > { %220 = sbr.rel (%p2424_p8) target bundleno = 1972 (0x7b4), region = 36  ;;  %s2564_s8 = sand.u32 (!%p2424_p8), 1, %s2317_s16  }
  0x62   : > { %s1515_s12 = sshll.u32 (!%p2424_p8), %s2564_s8, 10  ;;  %s223_s24 = scalar_lea.sflag (!%p2424_p8), [#allocation5], %s2564_s8 }
  0x63   : > { %s2568_s9 = scalar_lea.vmem (!%p2424_p8), [#allocation4], %s1515_s12  ;;  %p2901_p7 = scmp.ne.s32.totalorder (!%p2424_p8), %s2895_s25, 0 }
  0x68   : > { %2300 = dma.done.wait (%p2901_p7), %s223_s24, 16384  }
  0x69   : > { %2302 = vsyncadd (%p2901_p7), %s223_s24, 4294950912  ;;  %p2902_p2 = scmp.ne.s32.totalorder %s2893_s23, 0 }
  0x6b   : > { %2304 = dma.done.wait (%p2902_p2), [#allocation8], 14464  }
  0x6c   : > { %2306 = vsyncadd (%p2902_p2), [#allocation8], 4294952832  ;;  %v2340_v0 = vmov 0.0|0.0   ;;  %v2341_v1 = vmov 0.0   ;;  %v679_v2 = vld [vmem:[#allocation7] sm:$0xff]  ;;  %v680_v3 = vld [vmem:[#allocation7 + $0x8] sm:$0xff] }
  0x6d   : > { %1900 = vmatprep.subr.bf16.mxu0 %v2340_v0  ;;  %264 = vst [vmem:[#allocation3] sm:$0x1] %v2341_v1  ;;  %1924 = vmatprep.subr.bf16.mxu1 %v2340_v0  ;;  %v681_v4 = vld [vmem:[#allocation7 + $0x10] sm:$0xff]  ;;  %v1901_v5 = vpack.c.bf16 %v680_v3, %v679_v2  ;;  %v682_v6 = vld [vmem:[#allocation7 + $0x18] sm:$0xff]  ;;  %v683_v8 = vld [vmem:[#allocation7 + $0x20] sm:$0xff]  ;;  %vm2343_vm0 = vmmov 0  }
  0x6e   : > { %v1904_v7 = vpack.c.bf16 %v682_v6, %v681_v4  ;;  %v684_v9 = vld [vmem:[#allocation7 + $0x28] sm:$0xff]  ;;  %v2583_v10 = vld [vmem:[%s2568_s9] sm:$0xff]  ;;  %v2589_v12 = vld [vmem:[%s2568_s9 + $0x10] sm:$0xff]  ;;  %1687 = vmatprep.mubr.msk.f32.mxu0 %vm2343_vm0, %v2341_v1  ;;  %1722 = vmatprep.mubr.msk.f32.mxu1 %vm2343_vm0, %v2341_v1  ;;  %vm677_vm1 = vcmask 1040384   ;;  %s257_s23 = scalar_lea.vmem [#allocation10], %s2564_s8  ;;  %s1397_s29 = scalar_lea.sflag [#allocation6], %s2564_s8 }
  0x6f   : > { %1902 = vmatpush3.bf16.msra.mxu0 %v1901_v5  ;;  %v2586_v11 = vld [vmem:[%s2568_s9 + $0x8] sm:$0xff]  ;;  %v1907_v14 = vpack.c.bf16 %v684_v9, %v683_v8  ;;  %v685_v15 = vld [vmem:[#allocation7 + $0x30] sm:$0xff]  ;;  %v686_v16 = vld [vmem:[#allocation7 + $0x38] sm:$0xff]  ;;  %s1409_s25 = sshll.u32 %s257_s23, 4  ;;  %p2903_p12 = scmp.ne.s32.totalorder %s2899_s30, 0  ;;  %s2837_s25 = int_to_ptr.vmem [resolvable:$true] %s1409_s25 }
  0x70   : > { %1903 = vmatprep.subr.bf16.mxu0 %v2340_v0  ;;  %v530_v13 = vadd.f32 %v2586_v11, %v2583_v10  ;;  %v2594_v17 = vld [vmem:[%s2568_s9 + $0x18] sm:$0xff]  ;;  %v273_v18 = vld [vmem:[%s2568_s9 + $0x40] sm:$0xff]  ;;  %v274_v19 = vld [vmem:[%s2568_s9 + $0x48] sm:$0xff]  ;;  %v1910_v26 = vpack.c.bf16 %v686_v16, %v685_v15  ;;  %s2247_s14 = scalar_lea.vmem %s2837_s25, 16 }
  0x71   : > { %v275_v20 = vld [vmem:[%s2568_s9 + $0x50] sm:$0xff]  ;;  %v2602_v22 = vld [vmem:[%s2568_s9 + $0x20] sm:$0xff]  ;;  %v400_v23 = vmax.f32 %v274_v19, %v273_v18  ;;  %v276_v24 = vld [vmem:[%s2568_s9 + $0x58] sm:$0xff]  ;;  %p2248_p8 = scmp.ne.s32.totalorder %s2837_s25, %s2247_s14 }
  0x72   : > { %v531_v21 = vadd.f32 %v530_v13, %v2589_v12  ;;  %v2607_v27 = vld [vmem:[%s2568_s9 + $0x28] sm:$0xff]  ;;  %v687_v29 = vld [vmem:[#allocation7 + $0x40] sm:$0xff]  ;;  %v2613_v33 = vld [vmem:[%s2568_s9 + $0x30] sm:$0xff] }
  0x73   : > { %1905 = vmatpush3.bf16.msra.mxu0 %v1904_v7  ;;  %v401_v28 = vmax.f32 %v275_v20, %v400_v23  ;;  %v688_v30 = vld [vmem:[#allocation7 + $0x48] sm:$0xff]  ;;  %v277_v31 = vld [vmem:[%s2568_s9 + $0x60] sm:$0xff]  ;;  %v2618_v38 = vld [vmem:[%s2568_s9 + $0x38] sm:$0xff]  ;;  %p2249_p1 = pnand %p2248_p8, %p2903_p12 }
  0x74   : > { %1906 = vmatprep.subr.bf16.mxu0 %v2340_v0  ;;  %v532_v25 = vadd.f32 %v531_v21, %v2594_v17  ;;  %v278_v35 = vld [vmem:[%s2568_s9 + $0x68] sm:$0xff]  ;;  %v1913_v37 = vpack.c.bf16 %v688_v30, %v687_v29  ;;  %v689_v40 = vld [vmem:[#allocation7 + $0x50] sm:$0xff]  ;;  %v690_v41 = vld [vmem:[#allocation7 + $0x58] sm:$0xff] }
  0x75   : > { %v404_v34 = vmax.f32 %v276_v24, %v401_v28  ;;  %v279_v42 = vld [vmem:[%s2568_s9 + $0x70] sm:$0xff]  ;;  %v280_v45 = vld [vmem:[%s2568_s9 + $0x78] sm:$0xff]  ;;  %v1916_v47 = vpack.c.bf16 %v690_v41, %v689_v40  ;;  %v691_v49 = vld [vmem:[#allocation7 + $0x60] sm:$0xff]  ;;  %p2250_p10 = pneg %p2249_p1 }
  0x76   : > { %v533_v32 = vadd.f32 %v532_v25, %v2602_v22  ;;  %v692_v50 = vld [vmem:[#allocation7 + $0x68] sm:$0xff]  ;;  %v281_v51 = vld [vmem:[%s2568_s9 + $0x80] sm:$0xff]  ;;  %v693_v58 = vld [vmem:[#allocation7 + $0x70] sm:$0xff] }
  0x77   : > { %1908 = vmatpush3.bf16.msra.mxu0 %v1907_v14  ;;  %v405_v39 = vmax.f32 %v277_v31, %v404_v34  ;;  %v282_v54 = vld [vmem:[%s2568_s9 + $0x88] sm:$0xff]  ;;  %v1919_v56 = vpack.c.bf16 %v692_v50, %v691_v49  ;;  %v694_v59 = vld [vmem:[#allocation7 + $0x78] sm:$0xff]  ;;  %v283_v60 = vld [vmem:[%s2568_s9 + $0x90] sm:$0xff] }
  0x78   : > { %1909 = vmatprep.subr.bf16.mxu0 %v2340_v0  ;;  %v534_v36 = vadd.f32 %v533_v32, %v2607_v27  ;;  %v284_v63 = vld [vmem:[%s2568_s9 + $0x98] sm:$0xff]  ;;  %v1922_v3 = vpack.c.bf16 %v694_v59, %v693_v58  ;;  %v285_v5 = vld [vmem:[%s2568_s9 + $0xa0] sm:$0xff]  ;;  %v286_v8 = vld [vmem:[%s2568_s9 + $0xa8] sm:$0xff] }
  0x79   : > { %v408_v44 = vmax.f32 %v278_v35, %v405_v39  ;;  %v287_v14 = vld [vmem:[%s2568_s9 + $0xb0] sm:$0xff]  ;;  %v289_v21 = vld [vmem:[%s2568_s9 + $0xc0] sm:$0xff]  ;;  %v290_v25 = vld [vmem:[%s2568_s9 + $0xc8] sm:$0xff] }
  0x7a   : > { %v535_v43 = vadd.f32 %v534_v36, %v2613_v33  ;;  %v291_v29 = vld [vmem:[%s2568_s9 + $0xd0] sm:$0xff]  ;;  %v292_v32 = vld [vmem:[%s2568_s9 + $0xd8] sm:$0xff]  ;;  %v293_v36 = vld [vmem:[%s2568_s9 + $0xe0] sm:$0xff] }
  0x7b   : > { %1911 = vmatpush3.bf16.msra.mxu0 %v1910_v26  ;;  %v409_v48 = vmax.f32 %v279_v42, %v408_v44  ;;  %v294_v40 = vld [vmem:[%s2568_s9 + $0xe8] sm:$0xff]  ;;  %v297_v49 = vld [vmem:[%s2568_s9 + $0x100] sm:$0xff]  ;;  %v300_v58 = vld [vmem:[%s2568_s9 + $0x118] sm:$0xff] }
  0x7c   : > { %1912 = vmatprep.subr.bf16.mxu0 %v2340_v0  ;;  %v536_v46 = vadd.f32 %v535_v43, %v2618_v38  ;;  %v295_v43 = vld [vmem:[%s2568_s9 + $0xf0] sm:$0xff] }
  0x7d   : > { %v412_v53 = vmax.f32 %v280_v45, %v409_v48 }
  0x7e   : > { %v537_v52 = vadd.f32 %v536_v46, %v273_v18  ;;  %v288_v18 = vld [vmem:[%s2568_s9 + $0xb8] sm:$0xff] }
  0x7f   : > { %1914 = vmatpush3.bf16.msra.mxu0 %v1913_v37  ;;  %v413_v57 = vmax.f32 %v281_v51, %v412_v53  ;;  %v296_v46 = vld [vmem:[%s2568_s9 + $0xf8] sm:$0xff] }
  0x80   : > { %1915 = vmatprep.subr.bf16.mxu0 %v2340_v0  ;;  %v538_v55 = vadd.f32 %v537_v52, %v274_v19  ;;  %v298_v52 = vld [vmem:[%s2568_s9 + $0x108] sm:$0xff] }
  0x81   : > { %v416_v62 = vmax.f32 %v282_v54, %v413_v57 }
  0x82   : > { %v539_v61 = vadd.f32 %v538_v55, %v275_v20  ;;  %v299_v55 = vld [vmem:[%s2568_s9 + $0x110] sm:$0xff] }
  0x83   : > { %1917 = vmatpush3.bf16.msra.mxu0 %v1916_v47  ;;  %v417_v4 = vmax.f32 %v283_v60, %v416_v62 }
  0x84   : > { %1918 = vmatprep.subr.bf16.mxu0 %v2340_v0  ;;  %v540_v2 = vadd.f32 %v539_v61, %v276_v24  ;;  %v301_v61 = vld [vmem:[%s2568_s9 + $0x120] sm:$0xff] }
  0x85   : > { %v420_v7 = vmax.f32 %v284_v63, %v417_v4 }
  0x86   : > { %v541_v6 = vadd.f32 %v540_v2, %v277_v31  ;;  %v302_v2 = vld [vmem:[%s2568_s9 + $0x128] sm:$0xff] }
  0x87   : > { %1920 = vmatpush3.bf16.msra.mxu0 %v1919_v56  ;;  %v421_v13 = vmax.f32 %v285_v5, %v420_v7 }
  0x88   : > { %1921 = vmatprep.subr.bf16.mxu0 %v2340_v0  ;;  %v542_v9 = vadd.f32 %v541_v6, %v278_v35 }
  0x89   : > { %v424_v16 = vmax.f32 %v286_v8, %v421_v13 }
  0x8a   : > { %v543_v15 = vadd.f32 %v542_v9, %v279_v42 }
  0x8b   : > { %1923 = vmatpush3.bf16.msra.mxu0 %v1922_v3  ;;  %v425_v20 = vmax.f32 %v287_v14, %v424_v16 }
  0x8c   : > { %1948 = vmatprep.subr.bf16.mxu0 %v2340_v0  ;;  %v544_v19 = vadd.f32 %v543_v15, %v280_v45 }
  0x8d   : > { %v428_v24 = vmax.f32 %v288_v18, %v425_v20 }
  0x8e   : > { %v545_v23 = vadd.f32 %v544_v19, %v281_v51 }
  0x8f   : > { %v429_v28 = vmax.f32 %v289_v21, %v428_v24 }
  0x90   : > { %v546_v26 = vadd.f32 %v545_v23, %v282_v54 }
  0x91   : > { %v432_v31 = vmax.f32 %v290_v25, %v429_v28 }
  0x92   : > { %v547_v30 = vadd.f32 %v546_v26, %v283_v60 }
  0x93   : > { %v433_v35 = vmax.f32 %v291_v29, %v432_v31 }
  0x94   : > { %v548_v34 = vadd.f32 %v547_v30, %v284_v63 }
  0x95   : > { %v436_v39 = vmax.f32 %v292_v32, %v433_v35 }
  0x96   : > { %v549_v37 = vadd.f32 %v548_v34, %v285_v5  ;;  %v303_v5 = vld [vmem:[%s2568_s9 + $0x130] sm:$0xff] }
  0x97   : > { %v437_v42 = vmax.f32 %v293_v36, %v436_v39 }
  0x98   : > { %v550_v41 = vadd.f32 %v549_v37, %v286_v8  ;;  %v304_v8 = vld [vmem:[%s2568_s9 + $0x138] sm:$0xff] }
  0x99   : > { %v440_v45 = vmax.f32 %v294_v40, %v437_v42 }
  0x9a   : > { %v551_v44 = vadd.f32 %v550_v41, %v287_v14  ;;  %v305_v14 = vld [vmem:[%s2568_s9 + $0x140] sm:$0xff] }
  0x9b   : > { %v441_v48 = vmax.f32 %v295_v43, %v440_v45 }
  0x9c   : > { %v552_v47 = vadd.f32 %v551_v44, %v288_v18  ;;  %v306_v18 = vld [vmem:[%s2568_s9 + $0x148] sm:$0xff] }
  0x9d   : > { %v444_v51 = vmax.f32 %v296_v46, %v441_v48 }
  0x9e   : > { %v553_v50 = vadd.f32 %v552_v47, %v289_v21  ;;  %v307_v21 = vld [vmem:[%s2568_s9 + $0x150] sm:$0xff] }
  0x9f   : > { %v445_v54 = vmax.f32 %v297_v49, %v444_v51 }
  0xa0   : > { %v554_v53 = vadd.f32 %v553_v50, %v290_v25  ;;  %v308_v25 = vld [vmem:[%s2568_s9 + $0x158] sm:$0xff] }
  0xa1   : > { %v448_v57 = vmax.f32 %v298_v52, %v445_v54 }
  0xa2   : > { %v555_v56 = vadd.f32 %v554_v53, %v291_v29  ;;  %v309_v29 = vld [vmem:[%s2568_s9 + $0x160] sm:$0xff] }
  0xa3   : > { %v449_v60 = vmax.f32 %v299_v55, %v448_v57 }
  0xa4   : > { %v556_v59 = vadd.f32 %v555_v56, %v292_v32  ;;  %v310_v32 = vld [vmem:[%s2568_s9 + $0x168] sm:$0xff] }
  0xa5   : > { %v452_v63 = vmax.f32 %v300_v58, %v449_v60 }
  0xa6   : > { %v557_v62 = vadd.f32 %v556_v59, %v293_v36  ;;  %v311_v36 = vld [vmem:[%s2568_s9 + $0x170] sm:$0xff] }
  0xa7   : > { %v453_v4 = vmax.f32 %v301_v61, %v452_v63 }
  0xa8   : > { %v558_v3 = vadd.f32 %v557_v62, %v294_v40  ;;  %v312_v40 = vld [vmem:[%s2568_s9 + $0x178] sm:$0xff] }
  0xa9   : > { %v456_v7 = vmax.f32 %v302_v2, %v453_v4 }
  0xaa   : > { %v559_v6 = vadd.f32 %v558_v3, %v295_v43  ;;  %v313_v43 = vld [vmem:[%s2568_s9 + $0x180] sm:$0xff] }
  0xab   : > { %v457_v13 = vmax.f32 %v303_v5, %v456_v7 }
  0xac   : > { %v560_v9 = vadd.f32 %v559_v6, %v296_v46  ;;  %v314_v46 = vld [vmem:[%s2568_s9 + $0x188] sm:$0xff] }
  0xad   : > { %v460_v16 = vmax.f32 %v304_v8, %v457_v13 }
  0xae   : > { %v561_v15 = vadd.f32 %v560_v9, %v297_v49  ;;  %v315_v49 = vld [vmem:[%s2568_s9 + $0x190] sm:$0xff] }
  0xaf   : > { %v461_v20 = vmax.f32 %v305_v14, %v460_v16 }
  0xb0   : > { %v562_v19 = vadd.f32 %v561_v15, %v298_v52  ;;  %v316_v52 = vld [vmem:[%s2568_s9 + $0x198] sm:$0xff] }
  0xb1   : > { %v464_v24 = vmax.f32 %v306_v18, %v461_v20 }
  0xb2   : > { %v563_v23 = vadd.f32 %v562_v19, %v299_v55  ;;  %v317_v55 = vld [vmem:[%s2568_s9 + $0x1a0] sm:$0xff] }
  0xb3   : > { %v465_v28 = vmax.f32 %v307_v21, %v464_v24 }
  0xb4   : > { %v564_v26 = vadd.f32 %v563_v23, %v300_v58  ;;  %v318_v58 = vld [vmem:[%s2568_s9 + $0x1a8] sm:$0xff] }
  0xb5   : > { %v468_v31 = vmax.f32 %v308_v25, %v465_v28 }
  0xb6   : > { %v565_v30 = vadd.f32 %v564_v26, %v301_v61  ;;  %v319_v61 = vld [vmem:[%s2568_s9 + $0x1b0] sm:$0xff] }
  0xb7   : > { %v469_v35 = vmax.f32 %v309_v29, %v468_v31 }
  0xb8   : > { %v566_v34 = vadd.f32 %v565_v30, %v302_v2  ;;  %v320_v2 = vld [vmem:[%s2568_s9 + $0x1b8] sm:$0xff] }
  0xb9   : > { %v472_v39 = vmax.f32 %v310_v32, %v469_v35 }
  0xba   : > { %v567_v37 = vadd.f32 %v566_v34, %v303_v5  ;;  %v321_v5 = vld [vmem:[%s2568_s9 + $0x1c0] sm:$0xff] }
  0xbb   : > { %v473_v42 = vmax.f32 %v311_v36, %v472_v39 }
  0xbc   : > { %v568_v41 = vadd.f32 %v567_v37, %v304_v8  ;;  %v322_v8 = vld [vmem:[%s2568_s9 + $0x1c8] sm:$0xff] }
  0xbd   : > { %v476_v45 = vmax.f32 %v312_v40, %v473_v42 }
  0xbe   : > { %v569_v44 = vadd.f32 %v568_v41, %v305_v14  ;;  %v323_v14 = vld [vmem:[%s2568_s9 + $0x1d0] sm:$0xff] }
  0xbf   : > { %v477_v48 = vmax.f32 %v313_v43, %v476_v45 }
  0xc0   : > { %v570_v47 = vadd.f32 %v569_v44, %v306_v18  ;;  %v324_v18 = vld [vmem:[%s2568_s9 + $0x1d8] sm:$0xff] }
  0xc1   : > { %v480_v51 = vmax.f32 %v314_v46, %v477_v48 }
  0xc2   : > { %v571_v50 = vadd.f32 %v570_v47, %v307_v21  ;;  %v325_v21 = vld [vmem:[%s2568_s9 + $0x1e0] sm:$0xff] }
  0xc3   : > { %v481_v54 = vmax.f32 %v315_v49, %v480_v51 }
  0xc4   : > { %v572_v53 = vadd.f32 %v571_v50, %v308_v25  ;;  %v326_v25 = vld [vmem:[%s2568_s9 + $0x1e8] sm:$0xff] }
  0xc5   : > { %v484_v57 = vmax.f32 %v316_v52, %v481_v54 }
  0xc6   : > { %v573_v56 = vadd.f32 %v572_v53, %v309_v29  ;;  %v327_v29 = vld [vmem:[%s2568_s9 + $0x1f0] sm:$0xff] }
  0xc7   : > { %v485_v60 = vmax.f32 %v317_v55, %v484_v57 }
  0xc8   : > { %v574_v59 = vadd.f32 %v573_v56, %v310_v32  ;;  %v328_v32 = vld [vmem:[%s2568_s9 + $0x1f8] sm:$0xff] }
  0xc9   : > { %v488_v63 = vmax.f32 %v318_v58, %v485_v60 }
  0xca   : > { %v575_v62 = vadd.f32 %v574_v59, %v311_v36  ;;  %v329_v36 = vld [vmem:[%s2568_s9 + $0x200] sm:$0xff] }
  0xcb   : > { %v489_v4 = vmax.f32 %v319_v61, %v488_v63 }
  0xcc   : > { %v576_v3 = vadd.f32 %v575_v62, %v312_v40  ;;  %v330_v40 = vld [vmem:[%s2568_s9 + $0x208] sm:$0xff] }
  0xcd   : > { %v492_v7 = vmax.f32 %v320_v2, %v489_v4 }
  0xce   : > { %v577_v6 = vadd.f32 %v576_v3, %v313_v43  ;;  %v331_v43 = vld [vmem:[%s2568_s9 + $0x210] sm:$0xff] }
  0xcf   : > { %v493_v13 = vmax.f32 %v321_v5, %v492_v7 }
  0xd0   : > { %v578_v9 = vadd.f32 %v577_v6, %v314_v46  ;;  %v332_v46 = vld [vmem:[%s2568_s9 + $0x218] sm:$0xff] }
  0xd1   : > { %v496_v16 = vmax.f32 %v322_v8, %v493_v13 }
  0xd2   : > { %v579_v15 = vadd.f32 %v578_v9, %v315_v49  ;;  %v333_v49 = vld [vmem:[%s2568_s9 + $0x220] sm:$0xff] }
  0xd3   : > { %v497_v20 = vmax.f32 %v323_v14, %v496_v16  ;;  %v2342_v16 = vmov -inf  }
  0xd4   : > { %v580_v19 = vadd.f32 %v579_v15, %v316_v52  ;;  %v334_v52 = vld [vmem:[%s2568_s9 + $0x228] sm:$0xff]  ;;  %263 = vst [vmem:[#allocation2] sm:$0x1] %v2342_v16 }
  0xd5   : > { %v500_v24 = vmax.f32 %v324_v18, %v497_v20 }
  0xd6   : > { %v581_v23 = vadd.f32 %v580_v19, %v317_v55  ;;  %v335_v55 = vld [vmem:[%s2568_s9 + $0x230] sm:$0xff]  ;;  %v342_v19 = vld [vmem:[%s2568_s9 + $0x268] sm:$0xff] }
  0xd7   : > { %v501_v28 = vmax.f32 %v325_v21, %v500_v24 }
  0xd8   : > { %v582_v26 = vadd.f32 %v581_v23, %v318_v58  ;;  %v336_v58 = vld [vmem:[%s2568_s9 + $0x238] sm:$0xff]  ;;  %v343_v23 = vld [vmem:[%s2568_s9 + $0x270] sm:$0xff] }
  0xd9   : > { %v504_v31 = vmax.f32 %v326_v25, %v501_v28 }
  0xda   : > { %v583_v30 = vadd.f32 %v582_v26, %v319_v61  ;;  %v337_v61 = vld [vmem:[%s2568_s9 + $0x240] sm:$0xff]  ;;  %v344_v26 = vld [vmem:[%s2568_s9 + $0x278] sm:$0xff] }
  0xdb   : > { %v505_v35 = vmax.f32 %v327_v29, %v504_v31 }
  0xdc   : > { %v584_v34 = vadd.f32 %v583_v30, %v320_v2  ;;  %v338_v2 = vld [vmem:[%s2568_s9 + $0x248] sm:$0xff]  ;;  %v345_v30 = vld [vmem:[%s2568_s9 + $0x280] sm:$0xff] }
  0xdd   : > { %v508_v39 = vmax.f32 %v328_v32, %v505_v35 }
  0xde   : > { %v585_v37 = vadd.f32 %v584_v34, %v321_v5  ;;  %v339_v5 = vld [vmem:[%s2568_s9 + $0x250] sm:$0xff]  ;;  %v346_v34 = vld [vmem:[%s2568_s9 + $0x288] sm:$0xff] }
  0xdf   : > { %v509_v42 = vmax.f32 %v329_v36, %v508_v39 }
  0xe0   : > { %v586_v41 = vadd.f32 %v585_v37, %v322_v8  ;;  %v340_v8 = vld [vmem:[%s2568_s9 + $0x258] sm:$0xff]  ;;  %v347_v37 = vld [vmem:[%s2568_s9 + $0x290] sm:$0xff] }
  0xe1   : > { %v512_v45 = vmax.f32 %v330_v40, %v509_v42 }
  0xe2   : > { %v587_v44 = vadd.f32 %v586_v41, %v323_v14  ;;  %v341_v14 = vld [vmem:[%s2568_s9 + $0x260] sm:$0xff]  ;;  %v348_v41 = vld [vmem:[%s2568_s9 + $0x298] sm:$0xff] }
  0xe3   : > { %v513_v48 = vmax.f32 %v331_v43, %v512_v45 }
  0xe4   : > { %v588_v47 = vadd.f32 %v587_v44, %v324_v18  ;;  %v349_v44 = vld [vmem:[%s2568_s9 + $0x2a0] sm:$0xff] }
  0xe5   : > { %v516_v51 = vmax.f32 %v332_v46, %v513_v48 }
  0xe6   : > { %v589_v50 = vadd.f32 %v588_v47, %v325_v21  ;;  %v350_v47 = vld [vmem:[%s2568_s9 + $0x2a8] sm:$0xff] }
  0xe7   : > { %v517_v54 = vmax.f32 %v333_v49, %v516_v51  ;;  %v781_v51 = vld [vmem:[#allocation7 + $0x88] sm:$0xff] }
  0xe8   : > { %v590_v53 = vadd.f32 %v589_v50, %v326_v25  ;;  %v780_v50 = vld [vmem:[#allocation7 + $0x80] sm:$0xff] }
  0xe9   : > { %v398_v57 = vmax.f32 %v334_v52, %v517_v54 }
  0xea   : > { %v591_v56 = vadd.f32 %v590_v53, %v327_v29  ;;  %v351_v53 = vld [vmem:[%s2568_s9 + $0x2b0] sm:$0xff] }
  0xeb   : > { %v399_v60 = vmax.f32 %v335_v55, %v398_v57 }
  0xec   : > { %v592_v59 = vadd.f32 %v591_v56, %v328_v32  ;;  %v783_v56 = vld [vmem:[#allocation7 + $0x98] sm:$0xff] }
  0xed   : > { %v402_v63 = vmax.f32 %v336_v58, %v399_v60 }
  0xee   : > { %v593_v62 = vadd.f32 %v592_v59, %v329_v36 }
  0xef   : > { %v403_v4 = vmax.f32 %v337_v61, %v402_v63  ;;  %v785_v63 = vld [vmem:[#allocation7 + $0xa8] sm:$0xff] }
  0xf0   : > { %v594_v3 = vadd.f32 %v593_v62, %v330_v40  ;;  %v784_v62 = vld [vmem:[#allocation7 + $0xa0] sm:$0xff] }
  0xf1   : > { %v406_v7 = vmax.f32 %v338_v2, %v403_v4 }
  0xf2   : > { %v595_v6 = vadd.f32 %v594_v3, %v331_v43 }
  0xf3   : > { %v407_v13 = vmax.f32 %v339_v5, %v406_v7  ;;  %v1931_v7 = vpack.c.bf16 %v785_v63, %v784_v62  ;;  %v367_v62 = vld [vmem:[%s2568_s9 + $0x330] sm:$0xff] }
  0xf4   : > { %v596_v9 = vadd.f32 %v595_v6, %v332_v46 }
  0xf5   : > { %v410_v18 = vmax.f32 %v340_v8, %v407_v13  ;;  %v787_v13 = vld [vmem:[#allocation7 + $0xb8] sm:$0xff] }
  0xf6   : > { %v597_v15 = vadd.f32 %v596_v9, %v333_v49  ;;  %v786_v9 = vld [vmem:[#allocation7 + $0xb0] sm:$0xff] }
  0xf7   : > { %v411_v21 = vmax.f32 %v341_v14, %v410_v18  ;;  %v356_v18 = vld [vmem:[%s2568_s9 + $0x2d8] sm:$0xff] }
  0xf8   : > { %v598_v20 = vadd.f32 %v597_v15, %v334_v52  ;;  %v782_v52 = vld [vmem:[#allocation7 + $0x90] sm:$0xff] }
  0xf9   : > { %v414_v25 = vmax.f32 %v342_v19, %v411_v21  ;;  %v1928_v60 = vpack.c.bf16 %v783_v56, %v782_v52  ;;  %v365_v56 = vld [vmem:[%s2568_s9 + $0x320] sm:$0xff] }
  0xfa   : > { %v599_v24 = vadd.f32 %v598_v20, %v335_v55  ;;  %v1925_v55 = vpack.c.bf16 %v781_v51, %v780_v50  ;;  %v1934_v20 = vpack.c.bf16 %v787_v13, %v786_v9  ;;  %v363_v50 = vld [vmem:[%s2568_s9 + $0x310] sm:$0xff]  ;;  %v370_v9 = vld [vmem:[%s2568_s9 + $0x348] sm:$0xff] }
  0xfb   : > { %v415_v29 = vmax.f32 %v343_v23, %v414_v25  ;;  %v357_v25 = vld [vmem:[%s2568_s9 + $0x2e0] sm:$0xff] }
  0xfc   : > { %v600_v28 = vadd.f32 %v599_v24, %v336_v58  ;;  %v352_v58 = vld [vmem:[%s2568_s9 + $0x2b8] sm:$0xff]  ;;  %1926 = vmatpush3.bf16.msra.mxu1 %v1925_v55  ;;  %v789_v24 = vld [vmem:[#allocation7 + $0xc8] sm:$0xff] }
  0xfd   : > { %v418_v32 = vmax.f32 %v344_v26, %v415_v29  ;;  %1927 = vmatprep.subr.bf16.mxu1 %v2340_v0  ;;  %v358_v29 = vld [vmem:[%s2568_s9 + $0x2e8] sm:$0xff] }
  0xfe   : > { %v601_v31 = vadd.f32 %v600_v28, %v337_v61 }
  0xff   : > { %v419_v36 = vmax.f32 %v345_v30, %v418_v32 }
 0x100   : > { %v602_v35 = vadd.f32 %v601_v31, %v338_v2  ;;  %v353_v2 = vld [vmem:[%s2568_s9 + $0x2c0] sm:$0xff]  ;;  %1929 = vmatpush3.bf16.msra.mxu1 %v1928_v60 }
 0x101   : > { %v422_v40 = vmax.f32 %v346_v34, %v419_v36  ;;  %1930 = vmatprep.subr.bf16.mxu1 %v2340_v0  ;;  %v359_v36 = vld [vmem:[%s2568_s9 + $0x2f0] sm:$0xff] }
 0x102   : > { %v603_v39 = vadd.f32 %v602_v35, %v339_v5  ;;  %v354_v5 = vld [vmem:[%s2568_s9 + $0x2c8] sm:$0xff]  ;;  %v791_v35 = vld [vmem:[#allocation7 + $0xd8] sm:$0xff] }
 0x103   : > { %v423_v43 = vmax.f32 %v347_v37, %v422_v40  ;;  %v360_v40 = vld [vmem:[%s2568_s9 + $0x2f8] sm:$0xff] }
 0x104   : > { %v604_v42 = vadd.f32 %v603_v39, %v340_v8  ;;  %1932 = vmatpush3.bf16.msra.mxu1 %v1931_v7 }
 0x105   : > { %v426_v46 = vmax.f32 %v348_v41, %v423_v43  ;;  %1933 = vmatprep.subr.bf16.mxu1 %v2340_v0 }
 0x106   : > { %v605_v45 = vadd.f32 %v604_v42, %v341_v14  ;;  %v355_v14 = vld [vmem:[%s2568_s9 + $0x2d0] sm:$0xff] }
 0x107   : > { %v427_v49 = vmax.f32 %v349_v44, %v426_v46 }
 0x108   : > { %v606_v48 = vadd.f32 %v605_v45, %v342_v19  ;;  %1935 = vmatpush3.bf16.msra.mxu1 %v1934_v20 }
 0x109   : > { %v430_v57 = vmax.f32 %v350_v47, %v427_v49  ;;  %1936 = vmatprep.subr.bf16.mxu1 %v2340_v0 }
 0x10a   : > { %v607_v54 = vadd.f32 %v606_v48, %v343_v23  ;;  %v788_v23 = vld [vmem:[#allocation7 + $0xc0] sm:$0xff] }
 0x10b   : > { %v431_v61 = vmax.f32 %v351_v53, %v430_v57  ;;  %v1937_v31 = vpack.c.bf16 %v789_v24, %v788_v23  ;;  %v373_v23 = vld [vmem:[%s2568_s9 + $0x360] sm:$0xff] }
 0x10c   : > { %v608_v59 = vadd.f32 %v607_v54, %v344_v26 }
 0x10d   : > { %v434_v4 = vmax.f32 %v352_v58, %v431_v61  ;;  %1938 = vmatpush3.bf16.msra.mxu1 %v1937_v31 }
 0x10e   : > { %v609_v3 = vadd.f32 %v608_v59, %v345_v30  ;;  %1939 = vmatprep.subr.bf16.mxu1 %v2340_v0  ;;  %v366_v59 = vld [vmem:[%s2568_s9 + $0x328] sm:$0xff] }
 0x10f   : > { %v435_v8 = vmax.f32 %v353_v2, %v434_v4 }
 0x110   : > { %v610_v6 = vadd.f32 %v609_v3, %v346_v34  ;;  %v790_v34 = vld [vmem:[#allocation7 + $0xd0] sm:$0xff]  ;;  %v368_v3 = vld [vmem:[%s2568_s9 + $0x338] sm:$0xff] }
 0x111   : > { %v438_v16 = vmax.f32 %v354_v5, %v435_v8  ;;  %v1940_v42 = vpack.c.bf16 %v791_v35, %v790_v34  ;;  %v376_v34 = vld [vmem:[%s2568_s9 + $0x378] sm:$0xff] }
 0x112   : > { %v611_v15 = vadd.f32 %v610_v6, %v347_v37  ;;  %v369_v6 = vld [vmem:[%s2568_s9 + $0x340] sm:$0xff] }
 0x113   : > { %v439_v21 = vmax.f32 %v355_v14, %v438_v16  ;;  %1941 = vmatpush3.bf16.msra.mxu1 %v1940_v42 }
 0x114   : > { %v612_v19 = vadd.f32 %v611_v15, %v348_v41  ;;  %1942 = vmatprep.subr.bf16.mxu1 %v2340_v0  ;;  %v371_v15 = vld [vmem:[%s2568_s9 + $0x350] sm:$0xff] }
 0x115   : > { %v442_v28 = vmax.f32 %v356_v18, %v439_v21 }
 0x116   : > { %v613_v26 = vadd.f32 %v612_v19, %v349_v44  ;;  %v361_v44 = vld [vmem:[%s2568_s9 + $0x300] sm:$0xff]  ;;  %v372_v19 = vld [vmem:[%s2568_s9 + $0x358] sm:$0xff] }
 0x117   : > { %v443_v32 = vmax.f32 %v357_v25, %v442_v28 }
 0x118   : > { %v614_v30 = vadd.f32 %v613_v26, %v350_v47  ;;  %v362_v47 = vld [vmem:[%s2568_s9 + $0x308] sm:$0xff] }
 0x119   : > { %v446_v39 = vmax.f32 %v358_v29, %v443_v32  ;;  %v374_v26 = vld [vmem:[%s2568_s9 + $0x368] sm:$0xff] }
 0x11a   : > { %v615_v37 = vadd.f32 %v614_v30, %v351_v53  ;;  %v364_v53 = vld [vmem:[%s2568_s9 + $0x318] sm:$0xff]  ;;  %v375_v30 = vld [vmem:[%s2568_s9 + $0x370] sm:$0xff] }
 0x11b   : > { %v447_v43 = vmax.f32 %v359_v36, %v446_v39 }
 0x11c   : > { %v616_v41 = vadd.f32 %v615_v37, %v352_v58  ;;  %v377_v37 = vld [vmem:[%s2568_s9 + $0x380] sm:$0xff] }
 0x11d   : > { %v450_v46 = vmax.f32 %v360_v40, %v447_v43 }
 0x11e   : > { %v617_v45 = vadd.f32 %v616_v41, %v353_v2  ;;  %v378_v41 = vld [vmem:[%s2568_s9 + $0x388] sm:$0xff] }
 0x11f   : > { %v451_v49 = vmax.f32 %v361_v44, %v450_v46 }
 0x120   : > { %v618_v48 = vadd.f32 %v617_v45, %v354_v5 }
 0x121   : > { %v454_v52 = vmax.f32 %v362_v47, %v451_v49 }
 0x122   : > { %v619_v51 = vadd.f32 %v618_v48, %v355_v14 }
 0x123   : > { %v455_v55 = vmax.f32 %v363_v50, %v454_v52 }
 0x124   : > { %v620_v54 = vadd.f32 %v619_v51, %v356_v18 }
 0x125   : > { %v458_v58 = vmax.f32 %v364_v53, %v455_v55 }
 0x126   : > { %v621_v57 = vadd.f32 %v620_v54, %v357_v25 }
 0x127   : > { %v459_v61 = vmax.f32 %v365_v56, %v458_v58 }
 0x128   : > { %v622_v60 = vadd.f32 %v621_v57, %v358_v29 }
 0x129   : > { %v462_v2 = vmax.f32 %v366_v59, %v459_v61 }
 0x12a   : > { %v623_v63 = vadd.f32 %v622_v60, %v359_v36 }
 0x12b   : > { %v463_v5 = vmax.f32 %v367_v62, %v462_v2 }
 0x12c   : > { %v624_v4 = vadd.f32 %v623_v63, %v360_v40 }
 0x12d   : > { %v466_v8 = vmax.f32 %v368_v3, %v463_v5 }
 0x12e   : > { %v625_v7 = vadd.f32 %v624_v4, %v361_v44  ;;  %v379_v44 = vld [vmem:[%s2568_s9 + $0x390] sm:$0xff] }
 0x12f   : > { %v467_v14 = vmax.f32 %v369_v6, %v466_v8 }
 0x130   : > { %v626_v13 = vadd.f32 %v625_v7, %v362_v47  ;;  %v380_v47 = vld [vmem:[%s2568_s9 + $0x398] sm:$0xff] }
 0x131   : > { %v470_v18 = vmax.f32 %v370_v9, %v467_v14 }
 0x132   : > { %v627_v16 = vadd.f32 %v626_v13, %v363_v50  ;;  %v381_v50 = vld [vmem:[%s2568_s9 + $0x3a0] sm:$0xff] }
 0x133   : > { %v471_v21 = vmax.f32 %v371_v15, %v470_v18 }
 0x134   : > { %v628_v20 = vadd.f32 %v627_v16, %v364_v53  ;;  %v382_v53 = vld [vmem:[%s2568_s9 + $0x3a8] sm:$0xff] }
 0x135   : > { %v474_v25 = vmax.f32 %v372_v19, %v471_v21 }
 0x136   : > { %v629_v24 = vadd.f32 %v628_v20, %v365_v56  ;;  %v383_v56 = vld [vmem:[%s2568_s9 + $0x3b0] sm:$0xff] }
 0x137   : > { %v475_v29 = vmax.f32 %v373_v23, %v474_v25 }
 0x138   : > { %v630_v28 = vadd.f32 %v629_v24, %v366_v59  ;;  %v384_v59 = vld [vmem:[%s2568_s9 + $0x3b8] sm:$0xff] }
 0x139   : > { %v478_v32 = vmax.f32 %v374_v26, %v475_v29 }
 0x13a   : > { %v631_v31 = vadd.f32 %v630_v28, %v367_v62  ;;  %v385_v62 = vld [vmem:[%s2568_s9 + $0x3c0] sm:$0xff] }
 0x13b   : > { %v479_v36 = vmax.f32 %v375_v30, %v478_v32 }
 0x13c   : > { %v632_v35 = vadd.f32 %v631_v31, %v368_v3  ;;  %v386_v3 = vld [vmem:[%s2568_s9 + $0x3c8] sm:$0xff] }
 0x13d   : > { %v482_v40 = vmax.f32 %v376_v34, %v479_v36 }
 0x13e   : > { %v633_v39 = vadd.f32 %v632_v35, %v369_v6  ;;  %v387_v6 = vld [vmem:[%s2568_s9 + $0x3d0] sm:$0xff] }
 0x13f   : > { %v483_v43 = vmax.f32 %v377_v37, %v482_v40 }
 0x140   : > { %v634_v42 = vadd.f32 %v633_v39, %v370_v9  ;;  %v388_v9 = vld [vmem:[%s2568_s9 + $0x3d8] sm:$0xff] }
 0x141   : > { %v486_v46 = vmax.f32 %v378_v41, %v483_v43 }
 0x142   : > { %v635_v45 = vadd.f32 %v634_v42, %v371_v15  ;;  %v389_v15 = vld [vmem:[%s2568_s9 + $0x3e0] sm:$0xff] }
 0x143   : > { %v487_v49 = vmax.f32 %v379_v44, %v486_v46 }
 0x144   : > { %v636_v48 = vadd.f32 %v635_v45, %v372_v19  ;;  %v390_v19 = vld [vmem:[%s2568_s9 + $0x3e8] sm:$0xff] }
 0x145   : > { %v490_v52 = vmax.f32 %v380_v47, %v487_v49 }
 0x146   : > { %v637_v51 = vadd.f32 %v636_v48, %v373_v23  ;;  %v391_v23 = vld [vmem:[%s2568_s9 + $0x3f0] sm:$0xff] }
 0x147   : > { %v491_v55 = vmax.f32 %v381_v50, %v490_v52 }
 0x148   : > { %v638_v54 = vadd.f32 %v637_v51, %v374_v26  ;;  %v392_v26 = vld [vmem:[%s2568_s9 + $0x3f8] sm:$0xff]  ;;  %s1532_s9 = sshll.u32 %s2325_s18, 4  ;;  %s2344_s18 = smov [#allocation10]  }
 0x149   : > { %v494_v58 = vmax.f32 %v382_v53, %v491_v55  ;;  %s2835_s22 = scalar_lea.hbm %s2888_s4, %s1532_s9  ;;  %s2251_s28 = sshll.u32 %s2344_s18, 4  ;;  %s2252_s28 = int_to_ptr.vmem [resolvable:$false] %s2251_s28 }
 0x14a   : > { %v639_v57 = vadd.f32 %v638_v54, %v375_v30  ;;  %v396_v30 = vmax.f32 %v2589_v12, %v2613_v33  ;;  %s2253_s7 = scalar_lea.vmem %s2252_s28, 32  ;;  %p2254_p3 = scmp.lt.s32.totalorder %s2837_s25, %s2252_s28 }
 0x14b   : > { %v495_v61 = vmax.f32 %v383_v56, %v494_v58  ;;  %p2255_p5 = scmp.lt.s32.totalorder %s2253_s7, %s2247_s14 }
 0x14c   : > { %v640_v60 = vadd.f32 %v639_v57, %v376_v34  ;;  %v397_v34 = vmax.f32 %v2594_v17, %v2618_v38  ;;  %v672_v57 = vlaneseq }
 0x14d   : > { %v498_v2 = vmax.f32 %v384_v59, %v495_v61  ;;  %p2256_p9 = por %p2255_p5, %p2254_p3 }
 0x14e   : > { %v641_v63 = vadd.f32 %v640_v60, %v377_v37  ;;  %v394_v37 = vmax.f32 %v2583_v10, %v2602_v22  ;;  %v393_v22 = vld [vmem:[#allocation2] sm:$0x1]  ;;  %v673_v58 = vshrl.u32 %v672_v57, 7 }
 0x14f   : > { %v499_v5 = vmax.f32 %v385_v62, %v498_v2  ;;  %v993_v57 = vld [vmem:[#allocation7 + $0x1d8] sm:$0xff]  ;;  %p2257_p11 = pnand %p2256_p9, %p2250_p10 }
 0x150   : > { %v642_v4 = vadd.f32 %v641_v63, %v378_v41  ;;  %v395_v41 = vmax.f32 %v2586_v11, %v2607_v27  ;;  %v529_v27 = vld [vmem:[#allocation3] sm:$0x1] }
 0x151   : > { %v502_v8 = vmax.f32 %v386_v3, %v499_v5 }
 0x152   : > { %v643_v7 = vadd.f32 %v642_v4, %v379_v44  ;;  %v793_v4 = vld [vmem:[#allocation7 + $0xe8] sm:$0xff] }
 0x153   : > { %v503_v14 = vmax.f32 %v387_v6, %v502_v8 }
 0x154   : > { %v644_v13 = vadd.f32 %v643_v7, %v380_v47  ;;  %v795_v7 = vld [vmem:[#allocation7 + $0xf8] sm:$0xff] }
 0x155   : > { %v506_v18 = vmax.f32 %v388_v9, %v503_v14  ;;  %v883_v14 = vld [vmem:[#allocation7 + $0x110] sm:$0xff] }
 0x156   : > { %v645_v16 = vadd.f32 %v644_v13, %v381_v50  ;;  %v882_v13 = vld [vmem:[#allocation7 + $0x108] sm:$0xff] }
 0x157   : > { %v507_v21 = vmax.f32 %v389_v15, %v506_v18 }
 0x158   : > { %v646_v20 = vadd.f32 %v645_v16, %v382_v53  ;;  %v884_v16 = vld [vmem:[#allocation7 + $0x118] sm:$0xff] }
 0x159   : > { %v510_v25 = vmax.f32 %v390_v19, %v507_v21  ;;  %v1952_v18 = vpack.c.bf16 %v884_v16, %v883_v14  ;;  %v1083_v14 = vld [vmem:[#allocation7 + $0x200] sm:$0xff]  ;;  %v1085_v16 = vld [vmem:[#allocation7 + $0x210] sm:$0xff] }
 0x15a   : > { %v647_v24 = vadd.f32 %v646_v20, %v383_v56  ;;  %v886_v20 = vld [vmem:[#allocation7 + $0x128] sm:$0xff] }
 0x15b   : > { %v511_v29 = vmax.f32 %v391_v23, %v510_v25 }
 0x15c   : > { %v648_v28 = vadd.f32 %v647_v24, %v384_v59  ;;  %v674_v59 = vsub.s32 0, %v673_v58  ;;  %v888_v24 = vld [vmem:[#allocation7 + $0x138] sm:$0xff] }
 0x15d   : > { %v514_v32 = vmax.f32 %v392_v26, %v511_v29 }
 0x15e   : > { %v649_v31 = vadd.f32 %v648_v28, %v385_v62  ;;  %v890_v28 = vld [vmem:[#allocation7 + $0x148] sm:$0xff] }
 0x15f   : > { %v515_v36 = vmax.f32 %v396_v30, %v514_v32  ;;  %v891_v30 = vld [vmem:[#allocation7 + $0x150] sm:$0xff] }
 0x160   : > { %v650_v35 = vadd.f32 %v649_v31, %v386_v3  ;;  %v792_v3 = vld [vmem:[#allocation7 + $0xe0] sm:$0xff]  ;;  %v892_v31 = vld [vmem:[#allocation7 + $0x158] sm:$0xff] }
 0x161   : > { %v518_v40 = vmax.f32 %v397_v34, %v515_v36  ;;  %v1943_v5 = vpack.c.bf16 %v793_v4, %v792_v3  ;;  %v1964_v32 = vpack.c.bf16 %v892_v31, %v891_v30  ;;  %v1518_v34 = vld [vmem:[#allocation9] ss:$0 sm:$0xff]  ;;  %v1092_v30 = vld [vmem:[#allocation7 + $0x248] sm:$0xff] }
 0x162   : > { %v651_v39 = vadd.f32 %v650_v35, %v387_v6  ;;  %v794_v6 = vld [vmem:[#allocation7 + $0xf0] sm:$0xff]  ;;  %v1519_v35 = vld [vmem:[%s2887_s3] ss:$0 sm:$0xff] }
 0x163   : > { %v519_v43 = vmax.f32 %v394_v37, %v518_v40  ;;  %1944 = vmatpush3.bf16.msra.mxu1 %v1943_v5  ;;  %v1946_v8 = vpack.c.bf16 %v795_v7, %v794_v6  ;;  %v994_v5 = vld [vmem:[#allocation7 + $0x1e0] sm:$0xff]  ;;  %v995_v6 = vld [vmem:[#allocation7 + $0x1e8] sm:$0xff] }
 0x164   : > { %v652_v42 = vadd.f32 %v651_v39, %v388_v9  ;;  %1945 = vmatprep.subr.bf16.mxu1 %v2340_v0  ;;  %v881_v9 = vld [vmem:[#allocation7 + $0x100] sm:$0xff]  ;;  %v1991_v7 = vpack.c.bf16 %v995_v6, %v994_v5 }
 0x165   : > { %v520_v45 = vmax.f32 %v395_v41, %v519_v43  ;;  %v893_v43 = vld [vmem:[#allocation7 + $0x160] sm:$0xff] }
 0x166   : > { %v653_v44 = vadd.f32 %v652_v42, %v389_v15  ;;  %v1949_v15 = vpack.c.bf16 %v882_v13, %v881_v9  ;;  %v997_v9 = vld [vmem:[#allocation7 + $0x1f8] sm:$0xff] }
 0x167   : > { %v521_v33 = vrot.slane %v520_v45, 4  ;;  %1947 = vmatpush3.bf16.msra.mxu1 %v1946_v8  ;;  %v996_v8 = vld [vmem:[#allocation7 + $0x1f0] sm:$0xff] }
 0x168   : > { %v654_v12 = vadd.f32 %v653_v44, %v390_v19  ;;  %1972 = vmatprep.subr.bf16.mxu1 %v2340_v0  ;;  %v885_v19 = vld [vmem:[#allocation7 + $0x120] sm:$0xff]  ;;  %v894_v44 = vld [vmem:[#allocation7 + $0x168] sm:$0xff]  ;;  %v1994_v13 = vpack.c.bf16 %v997_v9, %v996_v8 }
 0x169   : > { %v522_v47 = vmax.f32 %v520_v45, %v521_v33  ;;  %v1955_v21 = vpack.c.bf16 %v886_v20, %v885_v19  ;;  %v1967_v45 = vpack.c.bf16 %v894_v44, %v893_v43  ;;  %v896_v33 = vld [vmem:[#allocation7 + $0x178] sm:$0xff]  ;;  %v1197_v8 = vld [vmem:[#allocation7 + $0x2e8] sm:$0xff] }
 0x16a   : > { %v655_v46 = vadd.f32 %v654_v12, %v391_v23  ;;  %v887_v23 = vld [vmem:[#allocation7 + $0x130] sm:$0xff]  ;;  %v1086_v19 = vld [vmem:[#allocation7 + $0x218] sm:$0xff] }
 0x16b   : > { %v523_v17 = vrot.slane %v522_v47, 2  ;;  %v1958_v25 = vpack.c.bf16 %v888_v24, %v887_v23  ;;  %v895_v12 = vld [vmem:[#allocation7 + $0x170] sm:$0xff]  ;;  %v2000_v20 = vpack.c.bf16 %v1086_v19, %v1085_v16  ;;  %v1088_v23 = vld [vmem:[#allocation7 + $0x228] sm:$0xff]  ;;  %v1285_v16 = vld [vmem:[#allocation7 + $0x300] sm:$0xff] }
 0x16c   : > { %v656_v48 = vadd.f32 %v655_v46, %v392_v26  ;;  %v889_v26 = vld [vmem:[#allocation7 + $0x140] sm:$0xff]  ;;  %v1970_v46 = vpack.c.bf16 %v896_v33, %v895_v12  ;;  %v1096_v12 = vld [vmem:[#allocation7 + $0x268] sm:$0xff]  ;;  %v1287_v19 = vld [vmem:[#allocation7 + $0x310] sm:$0xff] }
 0x16d   : > { %v524_v49 = vmax.f32 %v522_v47, %v523_v17  ;;  %v1961_v29 = vpack.c.bf16 %v890_v28, %v889_v26  ;;  %v982_v47 = vld [vmem:[#allocation7 + $0x180] sm:$0xff]  ;;  %v984_v17 = vld [vmem:[#allocation7 + $0x190] sm:$0xff]  ;;  %v1090_v26 = vld [vmem:[#allocation7 + $0x238] sm:$0xff] }
 0x16e   : > { %v657_v38 = vrot.slane %v656_v48, 4 }
 0x16f   : > { %v525_v51 = vrot.slane %v524_v49, 1 }
 0x170   : > { %v658_v50 = vadd.f32 %v657_v38, %v656_v48  ;;  %v983_v48 = vld [vmem:[#allocation7 + $0x188] sm:$0xff] }
 0x171   : > { %v526_v52 = vmax.f32 %v524_v49, %v525_v51  ;;  %v1973_v38 = vpack.c.bf16 %v983_v48, %v982_v47  ;;  %v985_v49 = vld [vmem:[#allocation7 + $0x198] sm:$0xff]  ;;  %v986_v51 = vld [vmem:[#allocation7 + $0x1a0] sm:$0xff] }
 0x172   : > { %v659_v10 = vrot.slane %v658_v50, 2  ;;  %v1098_v47 = vld [vmem:[#allocation7 + $0x278] sm:$0xff] }
 0x173   : > { %v527_v54 = vmax.f32 %v393_v22, %v526_v52  ;;  %v988_v52 = vld [vmem:[#allocation7 + $0x1b0] sm:$0xff] }
 0x174   : > { %v660_v53 = vadd.f32 %v659_v10, %v658_v50  ;;  %v1976_v50 = vpack.c.bf16 %v985_v49, %v984_v17  ;;  %v987_v10 = vld [vmem:[#allocation7 + $0x1a8] sm:$0xff]  ;;  %v1184_v17 = vld [vmem:[#allocation7 + $0x280] sm:$0xff]  ;;  %v1186_v49 = vld [vmem:[#allocation7 + $0x290] sm:$0xff] }
 0x175   : > { %528 = vst [vmem:[#allocation2] sm:$0x1] %v527_v54  ;;  %v1979_v22 = vpack.c.bf16 %v987_v10, %v986_v51  ;;  %v1187_v51 = vld [vmem:[#allocation7 + $0x298] sm:$0xff] }
 0x176   : > { %v661_v11 = vrot.slane %v660_v53, 1  ;;  %v2024_v10 = vpack.c.bf16 %v1187_v51, %v1186_v49  ;;  %v1529_v49 = vld [vmem:[%s2887_s3 + $0x5] ss:$0 sm:$0xff] }
 0x178   : > { %v662_v55 = vadd.f32 %v661_v11, %v660_v53  ;;  %v989_v53 = vld [vmem:[#allocation7 + $0x1b8] sm:$0xff]  ;;  %v990_v11 = vld [vmem:[#allocation7 + $0x1c0] sm:$0xff] }
 0x179   : > { %v1982_v54 = vpack.c.bf16 %v989_v53, %v988_v52  ;;  %v1189_v52 = vld [vmem:[#allocation7 + $0x2a8] sm:$0xff] }
 0x17a   : > { %v663_v56 = vadd.f32 %v662_v55, %v529_v27  ;;  %v991_v27 = vld [vmem:[#allocation7 + $0x1c8] sm:$0xff] }
 0x17b   : > { %v1985_v55 = vpack.c.bf16 %v991_v27, %v990_v11  ;;  %v1191_v11 = vld [vmem:[#allocation7 + $0x2b8] sm:$0xff] }
 0x17c   : > { %664 = vst [vmem:[#allocation3] sm:$0x1] %v663_v56  ;;  %v668_v62 = vld [vmem:[#allocation2] sm:$0x1]  ;;  %v992_v56 = vld [vmem:[#allocation7 + $0x1d0] sm:$0xff] }
 0x17d   : > { %v1988_v58 = vpack.c.bf16 %v993_v57, %v992_v56  ;;  %v1193_v56 = vld [vmem:[#allocation7 + $0x2c8] sm:$0xff] }
 0x183   : > { %v669_v60 = vld [vmem:[#allocation3] sm:$0x1] }
 0x184   : > { %v670_v61 = vmul.f32 0.0009765625, %v669_v60  ;;  %v1521_v60 = vld [vmem:[%s2887_s3 + $0x1] ss:$0 sm:$0xff] }
 0x186   : > { %v675_v63 = vrot.slane %v670_v61, %v674_v59  ;;  %v1520_v59 = vld [vmem:[#allocation9 + $0x1] ss:$0 sm:$0xff] }
 0x188   : > { %v678_v2 = vsel %vm677_vm1, %v668_v62, %v675_v63 }
 0x189   : > { %1688 = vmatmul.mubr.f32.vlgmr.msra.gmra.mrb[0].mxu0 %v678_v2 }
 0x18a   : > { %1757 = vmatprep.mubr.msk.f32.mxu0 %vm2343_vm0, %v2341_v1  ;;  %1950 = vmatpush3.bf16.msra.mxu0 %v1949_v15  ;;  %v1084_v15 = vld [vmem:[#allocation7 + $0x208] sm:$0xff] }
 0x18b   : > { %1951 = vmatprep.subr.bf16.mxu0 %v2340_v0 }
 0x18e   : > { %1953 = vmatpush3.bf16.msra.mxu0 %v1952_v18  ;;  %v1997_v18 = vpack.c.bf16 %v1084_v15, %v1083_v14  ;;  %v1199_v14 = vld [vmem:[#allocation7 + $0x2f8] sm:$0xff] }
 0x18f   : > { %1954 = vmatprep.subr.bf16.mxu0 %v2340_v0 }
 0x192   : > { %1956 = vmatpush3.bf16.msra.mxu0 %v1955_v21  ;;  %v1087_v21 = vld [vmem:[#allocation7 + $0x220] sm:$0xff] }
 0x193   : > { %1957 = vmatprep.subr.bf16.mxu0 %v2340_v0  ;;  %v2003_v24 = vpack.c.bf16 %v1088_v23, %v1087_v21  ;;  %v1288_v21 = vld [vmem:[#allocation7 + $0x318] sm:$0xff] }
 0x194   : > { %v2048_v23 = vpack.c.bf16 %v1288_v21, %v1287_v19 }
 0x196   : > { %1959 = vmatpush3.bf16.msra.mxu0 %v1958_v25  ;;  %v1089_v25 = vld [vmem:[#allocation7 + $0x230] sm:$0xff] }
 0x197   : > { %1960 = vmatprep.subr.bf16.mxu0 %v2340_v0  ;;  %v2006_v28 = vpack.c.bf16 %v1090_v26, %v1089_v25  ;;  %v1291_v26 = vld [vmem:[#allocation7 + $0x330] sm:$0xff] }
 0x19a   : > { %1962 = vmatpush3.bf16.msra.mxu0 %v1961_v29  ;;  %v1091_v29 = vld [vmem:[#allocation7 + $0x240] sm:$0xff] }
 0x19b   : > { %1963 = vmatprep.subr.bf16.mxu0 %v2340_v0  ;;  %v2009_v31 = vpack.c.bf16 %v1092_v30, %v1091_v29  ;;  %v1293_v30 = vld [vmem:[#allocation7 + $0x340] sm:$0xff] }
 0x19e   : > { %1965 = vmatpush3.bf16.msra.mxu0 %v1964_v32  ;;  %v1093_v32 = vld [vmem:[#allocation7 + $0x250] sm:$0xff] }
 0x19f   : > { %1966 = vmatprep.subr.bf16.mxu0 %v2340_v0 }
 0x1a2   : > { %1968 = vmatpush3.bf16.msra.mxu0 %v1967_v45  ;;  %v1095_v45 = vld [vmem:[#allocation7 + $0x260] sm:$0xff] }
 0x1a3   : > { %1969 = vmatprep.subr.bf16.mxu0 %v2340_v0  ;;  %v2015_v33 = vpack.c.bf16 %v1096_v12, %v1095_v45  ;;  %v1297_v12 = vld [vmem:[#allocation7 + $0x360] sm:$0xff] }
 0x1a6   : > { %1971 = vmatpush3.bf16.msra.mxu0 %v1970_v46  ;;  %v1097_v46 = vld [vmem:[#allocation7 + $0x270] sm:$0xff] }
 0x1a7   : > { %1996 = vmatprep.subr.bf16.mxu0 %v2340_v0  ;;  %v2018_v48 = vpack.c.bf16 %v1098_v47, %v1097_v46  ;;  %v1299_v47 = vld [vmem:[#allocation7 + $0x370] sm:$0xff] }
 0x25c   : > { %v767_v36 = vpop.f32.mrb[0].mxu0 }
 0x25d   : > { %v768_v37 = vadd.f32 %v1518_v34, %v767_v36  ;;  %v1689_v39 = vpop.f32.mrb[1].mxu0  ;;  %v1094_v34 = vld [vmem:[#allocation7 + $0x258] sm:$0xff]  ;;  %v1522_v36 = vld [vmem:[#allocation9 + $0x2] ss:$0 sm:$0xff] }
 0x25f   : > { %vm771_vm2 = vcmp.ge.f32.partialorder %v768_v37, 0.0  ;;  %v776_v40 = vmul.f32 %v1519_v35, %v768_v37  ;;  %v2012_v35 = vpack.c.bf16 %v1094_v34, %v1093_v32  ;;  %v1295_v34 = vld [vmem:[#allocation7 + $0x350] sm:$0xff] }
 0x261   : > { %v777_v41 = vsel %vm771_vm2, %v768_v37, %v776_v40  ;;  %v1523_v37 = vld [vmem:[%s2887_s3 + $0x2] ss:$0 sm:$0xff] }
 0x262   : > { %v778_v42 = vadd.f32 %v777_v41, %v678_v2 }
 0x264   : > { %1723 = vmatmul.mubr.f32.vlgmr.msra.gmra.mrb[0].mxu1 %v778_v42 }
 0x265   : > { %1792 = vmatprep.mubr.msk.f32.mxu1 %vm2343_vm0, %v2341_v1  ;;  %1974 = vmatpush3.bf16.msra.mxu1 %v1973_v38  ;;  %v1185_v38 = vld [vmem:[#allocation7 + $0x288] sm:$0xff] }
 0x266   : > { %1975 = vmatprep.subr.bf16.mxu1 %v2340_v0 }
 0x269   : > { %1977 = vmatpush3.bf16.msra.mxu1 %v1976_v50  ;;  %v2021_v50 = vpack.c.bf16 %v1185_v38, %v1184_v17  ;;  %v1528_v38 = vld [vmem:[#allocation9 + $0x5] ss:$0 sm:$0xff] }
 0x26a   : > { %1978 = vmatprep.subr.bf16.mxu1 %v2340_v0 }
 0x26d   : > { %1980 = vmatpush3.bf16.msra.mxu1 %v1979_v22  ;;  %v1188_v22 = vld [vmem:[#allocation7 + $0x2a0] sm:$0xff] }
 0x26e   : > { %1981 = vmatprep.subr.bf16.mxu1 %v2340_v0  ;;  %v2027_v53 = vpack.c.bf16 %v1189_v52, %v1188_v22 }
 0x271   : > { %1983 = vmatpush3.bf16.msra.mxu1 %v1982_v54  ;;  %v1190_v54 = vld [vmem:[#allocation7 + $0x2b0] sm:$0xff] }
 0x272   : > { %1984 = vmatprep.subr.bf16.mxu1 %v2340_v0  ;;  %v2030_v27 = vpack.c.bf16 %v1191_v11, %v1190_v54  ;;  %v1530_v54 = vld [vmem:[#allocation9 + $0x6] ss:$0 sm:$0xff] }
 0x275   : > { %1986 = vmatpush3.bf16.msra.mxu1 %v1985_v55  ;;  %v1192_v55 = vld [vmem:[#allocation7 + $0x2c0] sm:$0xff] }
 0x276   : > { %1987 = vmatprep.subr.bf16.mxu1 %v2340_v0  ;;  %v2033_v57 = vpack.c.bf16 %v1193_v56, %v1192_v55 }
 0x279   : > { %1989 = vmatpush3.bf16.msra.mxu1 %v1988_v58  ;;  %v1194_v58 = vld [vmem:[#allocation7 + $0x2d0] sm:$0xff] }
 0x27a   : > { %1990 = vmatprep.subr.bf16.mxu1 %v2340_v0 }
 0x27d   : > { %1992 = vmatpush3.bf16.msra.mxu1 %v1991_v7  ;;  %v1196_v7 = vld [vmem:[#allocation7 + $0x2e0] sm:$0xff] }
 0x27e   : > { %1993 = vmatprep.subr.bf16.mxu1 %v2340_v0  ;;  %v2039_v9 = vpack.c.bf16 %v1197_v8, %v1196_v7 }
 0x281   : > { %1995 = vmatpush3.bf16.msra.mxu1 %v1994_v13  ;;  %v1198_v13 = vld [vmem:[#allocation7 + $0x2f0] sm:$0xff] }
 0x282   : > { %2020 = vmatprep.subr.bf16.mxu1 %v2340_v0  ;;  %v2042_v15 = vpack.c.bf16 %v1199_v14, %v1198_v13 }
 0x337   : > { %v868_v61 = vpop.f32.mrb[0].mxu1 }
 0x338   : > { %v869_v62 = vadd.f32 %v1520_v59, %v868_v61  ;;  %v1724_v63 = vpop.f32.mrb[1].mxu1  ;;  %v1195_v59 = vld [vmem:[#allocation7 + $0x2d8] sm:$0xff]  ;;  %v1524_v61 = vld [vmem:[#allocation9 + $0x3] ss:$0 sm:$0xff] }
 0x33a   : > { %vm872_vm3 = vcmp.ge.f32.partialorder %v869_v62, 0.0  ;;  %v877_v2 = vmul.f32 %v1521_v60, %v869_v62  ;;  %v2036_v60 = vpack.c.bf16 %v1195_v59, %v1194_v58 }
 0x33c   : > { %v878_v3 = vsel %vm872_vm3, %v869_v62, %v877_v2  ;;  %v1525_v62 = vld [vmem:[%s2887_s3 + $0x3] ss:$0 sm:$0xff] }
 0x33d   : > { %v879_v4 = vadd.f32 %v878_v3, %v778_v42 }
 0x33f   : > { %1758 = vmatmul.mubr.f32.vlgmr.msra.gmra.mrb[2].mxu0 %v879_v4 }
 0x340   : > { %1827 = vmatprep.mubr.msk.f32.mxu0 %vm2343_vm0, %v2341_v1  ;;  %1998 = vmatpush3.bf16.msra.mxu0 %v1997_v18  ;;  %v1286_v18 = vld [vmem:[#allocation7 + $0x308] sm:$0xff] }
 0x341   : > { %1999 = vmatprep.subr.bf16.mxu0 %v2340_v0 }
 0x344   : > { %2001 = vmatpush3.bf16.msra.mxu0 %v2000_v20  ;;  %v2045_v20 = vpack.c.bf16 %v1286_v18, %v1285_v16 }
 0x345   : > { %2002 = vmatprep.subr.bf16.mxu0 %v2340_v0 }
 0x348   : > { %2004 = vmatpush3.bf16.msra.mxu0 %v2003_v24  ;;  %v1290_v24 = vld [vmem:[#allocation7 + $0x328] sm:$0xff] }
 0x349   : > { %2005 = vmatprep.subr.bf16.mxu0 %v2340_v0 }
 0x34c   : > { %2007 = vmatpush3.bf16.msra.mxu0 %v2006_v28  ;;  %v1292_v28 = vld [vmem:[#allocation7 + $0x338] sm:$0xff] }
 0x34d   : > { %2008 = vmatprep.subr.bf16.mxu0 %v2340_v0  ;;  %v2054_v29 = vpack.c.bf16 %v1292_v28, %v1291_v26 }
 0x350   : > { %2010 = vmatpush3.bf16.msra.mxu0 %v2009_v31  ;;  %v1294_v31 = vld [vmem:[#allocation7 + $0x348] sm:$0xff] }
 0x351   : > { %2011 = vmatprep.subr.bf16.mxu0 %v2340_v0  ;;  %v2057_v32 = vpack.c.bf16 %v1294_v31, %v1293_v30 }
 0x354   : > { %2013 = vmatpush3.bf16.msra.mxu0 %v2012_v35  ;;  %v1296_v35 = vld [vmem:[#allocation7 + $0x358] sm:$0xff] }
 0x355   : > { %2014 = vmatprep.subr.bf16.mxu0 %v2340_v0 }
 0x358   : > { %2016 = vmatpush3.bf16.msra.mxu0 %v2015_v33  ;;  %v1298_v33 = vld [vmem:[#allocation7 + $0x368] sm:$0xff] }
 0x359   : > { %2017 = vmatprep.subr.bf16.mxu0 %v2340_v0  ;;  %v2063_v46 = vpack.c.bf16 %v1298_v33, %v1297_v12 }
 0x35c   : > { %2019 = vmatpush3.bf16.msra.mxu0 %v2018_v48  ;;  %v1300_v48 = vld [vmem:[#allocation7 + $0x378] sm:$0xff] }
 0x35d   : > { %2044 = vmatprep.subr.bf16.mxu0 %v2340_v0  ;;  %v2066_v17 = vpack.c.bf16 %v1300_v48, %v1299_v47 }
 0x412   : > { %v969_v39 = vpop.f32.mrb[2].mxu0 }
 0x413   : > { %v970_v40 = vadd.f32 %v1522_v36, %v969_v39  ;;  %v1759_v41 = vpop.f32.mrb[3].mxu0  ;;  %v2060_v36 = vpack.c.bf16 %v1296_v35, %v1295_v34  ;;  %v1527_v39 = vld [vmem:[%s2887_s3 + $0x4] ss:$0 sm:$0xff] }
 0x415   : > { %vm973_vm4 = vcmp.ge.f32.partialorder %v970_v40, 0.0  ;;  %v978_v42 = vmul.f32 %v1523_v37, %v970_v40  ;;  %v1526_v37 = vld [vmem:[#allocation9 + $0x4] ss:$0 sm:$0xff] }
 0x417   : > { %v979_v43 = vsel %vm973_vm4, %v970_v40, %v978_v42 }
 0x418   : > { %v980_v44 = vadd.f32 %v979_v43, %v879_v4 }
 0x41a   : > { %1793 = vmatmul.mubr.f32.vlgmr.msra.gmra.mrb[2].mxu1 %v980_v44 }
 0x41b   : > { %1862 = vmatprep.mubr.msk.f32.mxu1 %vm2343_vm0, %v2341_v1  ;;  %2022 = vmatpush3.bf16.msra.mxu1 %v2021_v50 }
 0x41c   : > { %2023 = vmatprep.subr.bf16.mxu1 %v2340_v0 }
 0x41f   : > { %2025 = vmatpush3.bf16.msra.mxu1 %v2024_v10 }
 0x420   : > { %2026 = vmatprep.subr.bf16.mxu1 %v2340_v0 }
 0x423   : > { %2028 = vmatpush3.bf16.msra.mxu1 %v2027_v53 }
 0x424   : > { %2029 = vmatprep.subr.bf16.mxu1 %v2340_v0 }
 0x427   : > { %2031 = vmatpush3.bf16.msra.mxu1 %v2030_v27 }
 0x428   : > { %2032 = vmatprep.subr.bf16.mxu1 %v2340_v0 }
 0x42b   : > { %2034 = vmatpush3.bf16.msra.mxu1 %v2033_v57 }
 0x42c   : > { %2035 = vmatprep.subr.bf16.mxu1 %v2340_v0 }
 0x42f   : > { %2037 = vmatpush3.bf16.msra.mxu1 %v2036_v60 }
 0x430   : > { %2038 = vmatprep.subr.bf16.mxu1 %v2340_v0 }
 0x433   : > { %2040 = vmatpush3.bf16.msra.mxu1 %v2039_v9 }
 0x434   : > { %2041 = vmatprep.subr.bf16.mxu1 %v2340_v0 }
 0x437   : > { %2043 = vmatpush3.bf16.msra.mxu1 %v2042_v15 }
 0x4ed   : > { %v1070_v63 = vpop.f32.mrb[2].mxu1 }
 0x4ee   : > { %v1071_v2 = vadd.f32 %v1524_v61, %v1070_v63  ;;  %v1794_v3 = vpop.f32.mrb[3].mxu1 }
 0x4f0   : > { %vm1074_vm5 = vcmp.ge.f32.partialorder %v1071_v2, 0.0  ;;  %v1079_v4 = vmul.f32 %v1525_v62, %v1071_v2 }
 0x4f2   : > { %v1080_v5 = vsel %vm1074_vm5, %v1071_v2, %v1079_v4 }
 0x4f3   : > { %v1081_v6 = vadd.f32 %v1080_v5, %v980_v44 }
 0x4f5   : > { %1828 = vmatmul.mubr.f32.vlgmr.msra.gmra.mrb[4].mxu0 %v1081_v6 }
 0x4f6   : > { %1897 = vmatprep.mubr.msk.f32.mxu0 %vm2343_vm0, %v2341_v1  ;;  %2046 = vmatpush3.bf16.msra.mxu0 %v2045_v20  ;;  %v1289_v1 = vld [vmem:[#allocation7 + $0x320] sm:$0xff] }
 0x4f7   : > { %2047 = vmatprep.subr.bf16.mxu0 %v2340_v0  ;;  %v2051_v25 = vpack.c.bf16 %v1290_v24, %v1289_v1 }
 0x4fa   : > { %2049 = vmatpush3.bf16.msra.mxu0 %v2048_v23 }
 0x4fb   : > { %2050 = vmatprep.subr.bf16.mxu0 %v2340_v0 }
 0x4fe   : > { %2052 = vmatpush3.bf16.msra.mxu0 %v2051_v25 }
 0x4ff   : > { %2053 = vmatprep.subr.bf16.mxu0 %v2340_v0 }
 0x502   : > { %2055 = vmatpush3.bf16.msra.mxu0 %v2054_v29 }
 0x503   : > { %2056 = vmatprep.subr.bf16.mxu0 %v2340_v0 }
 0x506   : > { %2058 = vmatpush3.bf16.msra.mxu0 %v2057_v32 }
 0x507   : > { %2059 = vmatprep.subr.bf16.mxu0 %v2340_v0 }
 0x50a   : > { %2061 = vmatpush3.bf16.msra.mxu0 %v2060_v36 }
 0x50b   : > { %2062 = vmatprep.subr.bf16.mxu0 %v2340_v0 }
 0x50e   : > { %2064 = vmatpush3.bf16.msra.mxu0 %v2063_v46 }
 0x50f   : > { %2065 = vmatprep.subr.bf16.mxu0 %v2340_v0  ;;  %v1531_v0 = vld [vmem:[%s2887_s3 + $0x6] ss:$0 sm:$0xff] }
 0x512   : > { %2067 = vmatpush3.bf16.msra.mxu0 %v2066_v17 }
 0x5c8   : > { %v1171_v40 = vpop.f32.mrb[4].mxu0 }
 0x5c9   : > { %v1172_v41 = vadd.f32 %v1526_v37, %v1171_v40  ;;  %v1829_v42 = vpop.f32.mrb[5].mxu0 }
 0x5cb   : > { %vm1175_vm6 = vcmp.ge.f32.partialorder %v1172_v41, 0.0  ;;  %v1180_v43 = vmul.f32 %v1527_v39, %v1172_v41 }
 0x5cd   : > { %v1181_v44 = vsel %vm1175_vm6, %v1172_v41, %v1180_v43 }
 0x5ce   : > { %v1182_v45 = vadd.f32 %v1181_v44, %v1081_v6 }
 0x5d0   : > { %1863 = vmatmul.mubr.f32.vlgmr.msra.gmra.mrb[4].mxu1 %v1182_v45 }
 0x6a3   : > { %v1272_v50 = vpop.f32.mrb[4].mxu1 }
 0x6a4   : > { %v1273_v51 = vadd.f32 %v1528_v38, %v1272_v50  ;;  %v1864_v10 = vpop.f32.mrb[5].mxu1 }
 0x6a6   : > { %vm1276_vm7 = vcmp.ge.f32.partialorder %v1273_v51, 0.0  ;;  %v1281_v22 = vmul.f32 %v1529_v49, %v1273_v51 }
 0x6a8   : > { %v1282_v52 = vsel %vm1276_vm7, %v1273_v51, %v1281_v22 }
 0x6a9   : > { %v1283_v53 = vadd.f32 %v1282_v52, %v1182_v45 }
 0x6ab   : > { %1898 = vmatmul.mubr.f32.vlgmr.msra.gmra.mrb[6].mxu0 %v1283_v53 }
 0x77e   : > { %v1373_v11 = vpop.f32.mrb[6].mxu0 }
 0x77f   : > { %v1374_v27 = vadd.f32 %v1530_v54, %v1373_v11  ;;  %v1899_v55 = vpop.f32.mrb[7].mxu0 }
 0x781   : > { %vm1377_vm8 = vcmp.ge.f32.partialorder %v1374_v27, 0.0  ;;  %v1382_v56 = vmul.f32 %v1531_v0, %v1374_v27 }
 0x783   : > { %v1383_v57 = vsel %vm1377_vm8, %v1374_v27, %v1382_v56 }
 0x784   : > { %v1384_v58 = vadd.f32 %v1383_v57, %v1283_v53 }
 0x786   : > { %v1386_v59 = vrot.slane %v1384_v58, 1 }
 0x788   : > { %v1388_v60 = vadd.f32 %v1386_v59, %v1384_v58 }
 0x78a   : > { %v1389_v61 = vsub.f32 0.0, %v1388_v60 }
 0x78c   : > { %v1390_v62 = vmul.f32 1.442695, %v1389_v61 }
 0x78e   : > { %2157 = vpow2.f32 %v1390_v62 }
 0x798   : > { %v2158_v63 = vpop.eup %2157 }
 0x799   : > { %v1392_v2 = vadd.f32 1.0, %v2158_v63 }
 0x79b   : > { %2159 = vrcp.f32 %v1392_v2 }
 0x7a5   : > { %v2160_v3 = vpop.eup %2159 }
 0x7a6   : > { %1395 = vst [vmem:[%s257_s23] sm:$0x1] %v2160_v3 }
 0x7a7   : > { %2260 = shalt.err (!%p2257_p11)
}
 0x7a8   : > { %s2261_s8 = scalar_lea.hbm %s2835_s22, 16  ;;  %s2265_s13 = scalar_lea.hbm %s2888_s4, 32 }
 0x7a9   : > { %p2262_p0 = scmp.ne.s32.totalorder %s2835_s22, %s2261_s8  ;;  %p2266_p6 = scmp.lt.u32.totalorder %s2835_s22, %s2888_s4 }
 0x7aa   : > { %p2267_p7 = scmp.lt.u32.totalorder %s2265_s13, %s2261_s8  ;;  %p2269_p8 = scmp.lt.u32.totalorder %s2261_s8, %s2835_s22 }
 0x7ab   : > { %p2263_p4 = pnand %p2262_p0, %p2903_p12 }
 0x7ac   : > { %p2268_p2 = por %p2267_p7, %p2266_p6 }
 0x7ad   : > { %p2264_p13 = pneg %p2263_p4 }
 0x7ae   : > { %p2270_p1 = por %p2269_p8, %p2268_p2 }
 0x7b0   : > { %p2271_p10 = pnand %p2270_p1, %p2264_p13 }
 0x7b2   : > { %2274 = shalt.err (!%p2271_p10)
}
 0x7b3   : > { %2078 = dma.vmem_to_hbm [thread:$0]  (%p2903_p12), %s2837_s25, 16, %s2835_s22, %s1397_s29  }
 0x7b4 PF: > { %s1421_s9 = sand.u32 1, %s2313_s15   ;;  %p2904_p3 = scmp.ne.s32.totalorder %s2896_s26, 0 }
 0x7b5   : > { %p2905_p5 = scmp.ge.s32.totalorder %s2333_s20, 2  ;;  %s1422_s23 = scalar_lea.sflag [#allocation6], %s1421_s9 }
 0x7b7   : > { %p2092_p9 = pnand %p2905_p5, %p2904_p3 }
 0x7b9   : > { %2308 = dma.done.wait (!%p2092_p9), %s1422_s23, 16  }
 0x7ba   : > { %2310 = vsyncadd (!%p2092_p9), %s1422_s23, 4294967280  ;;  %s21_s20 = sadd.s32 1, %s2333_s20   ;;  %s2906_s15 = smov %s2317_s16 }
 0x7bb   : > { %p18_p11 = scmp.ge.s32.totalorder %s21_s20, 4   ;;  %s2907_s16 = smov %s2321_s17 }
 0x7bc   : > { %s2908_s17 = smov %s2515_s11  ;;  %s2909_s18 = smov %s2329_s19 }
 0x7bd   : > { %s2910_s19 = smov %s2912_s5  ;;  %20 = sbr.rel (!%p18_p11) target bundleno = 7 (0x7), region = 103 }
 0x7c4   :  { %1426 = vsyncpa [#allocation5], 1 }
 0x7c5   :  { %1428 = vsyncpa [#allocation5 + $0x1], 1 }
 0x7c6   :  { %1429 = vsyncpa [#allocation8], 1 }
 0x7c7   :  { %1430 = vsyncpa [#allocation6], 1 }
 0x7c8   :  { %1432 = vsyncpa [#allocation6 + $0x1], 1 }

</bundles_post_ra>
